<compile_context>
chip_gen: v7x
topology: tpu7x:2x2x1
jax: 0.10.0
libtpu: 0.0.40
codegen_flags: <defaults>
</compile_context>

<pallas_src>
import functools

import jax
import jax.numpy as jnp
from jax.experimental import pallas as pl
from jax.experimental.pallas import tpu as pltpu

LN_EPS = 1e-5
MASK_BIAS = -1e30                 # additive key-padding mask (== masked_fill(-max))
VMEM_LIMIT = 48 * 1024 * 1024     # leaves headroom on v7x (64 MiB/TC); > defaults on v5e/v6e


def _pick_tile(dim, pref, align):
    """Largest tile <= pref that divides `dim` and is a multiple of `align`;
    falls back to the full dim (always legal for BlockSpec)."""
    if dim <= pref:
        return dim
    if dim % align != 0:
        return dim
    t = (pref // align) * align
    while t > 0 and dim % t != 0:
        t -= align
    return t if t > 0 else dim


def _layernorm(x, g, b):
    # f32 statistics (inputs are f32)
    mean = jnp.mean(x, axis=-1, keepdims=True)
    d = x - mean
    var = jnp.mean(d * d, axis=-1, keepdims=True)
    return d * jax.lax.rsqrt(var + LN_EPS) * g + b


def _mish(x):
    # mish(x) = x * tanh(softplus(x)), numerically-stable softplus (f32)
    sp = jnp.maximum(x, 0.0) + jnp.log1p(jnp.exp(-jnp.abs(x)))
    return x * jnp.tanh(sp)


def _bf16(x):
    return x.astype(jnp.bfloat16)


# ----------------------------------------------------------------------------
# Kernel 1: tiled linear (input projection)  y = x @ w + b       (w is bf16)
# ----------------------------------------------------------------------------

def _matmul_kernel(x_ref, w_ref, b_ref, o_ref, acc_ref):
    @pl.when(pl.program_id(2) == 0)
    def _():
        acc_ref[...] = jnp.zeros_like(acc_ref)

    acc_ref[...] += jnp.dot(_bf16(x_ref[...]), w_ref[...],
                            preferred_element_type=jnp.float32)

    @pl.when(pl.program_id(2) == pl.num_programs(2) - 1)
    def _():
        o_ref[...] = acc_ref[...] + b_ref[...]


def linear(x, w_bf16, b, *, tm=512, tn=1024, tk=1024):
    M, K = x.shape
    N = w_bf16.shape[1]
    tm = _pick_tile(M, tm, 8)
    tn = _pick_tile(N, tn, 128)
    tk = _pick_tile(K, tk, 128)
    grid = (M // tm, N // tn, K // tk)
    cost = pl.CostEstimate(flops=2 * M * K * N, transcendentals=0,
                           bytes_accessed=4 * M * K + 2 * K * N + 4 * M * N)
    return pl.pallas_call(
        _matmul_kernel,
        out_shape=jax.ShapeDtypeStruct((M, N), jnp.float32),
        grid=grid,
        in_specs=[pl.BlockSpec((tm, tk), lambda i, j, k: (i, k)),
                  pl.BlockSpec((tk, tn), lambda i, j, k: (k, j)),
                  pl.BlockSpec((1, tn), lambda i, j, k: (0, j))],
        out_specs=pl.BlockSpec((tm, tn), lambda i, j, k: (i, j)),
        scratch_shapes=[pltpu.VMEM((tm, tn), jnp.float32)],
        compiler_params=pltpu.CompilerParams(
            dimension_semantics=("parallel", "parallel", "arbitrary"),
            vmem_limit_bytes=VMEM_LIMIT),
        cost_estimate=cost,
    )(x, w_bf16, b.reshape(1, N))


# ----------------------------------------------------------------------------
# Kernel 2: fused LayerNorm + single (C, 3C) QKV projection
#   - dp_scale pre-folded into the Q slice of Wqkv/bqkv by the wrapper
#   - Q/K/V emitted as bf16 (they only feed matmuls)
# ----------------------------------------------------------------------------

def _ln_qkv_kernel(x_ref, g_ref, bln_ref, w_ref, bqkv_ref, q_ref, k_ref, v_ref):
    C = x_ref.shape[1]
    xn = _layernorm(x_ref[...], g_ref[...], bln_ref[...])          # f32 stats
    qkv = jnp.dot(_bf16(xn), w_ref[...],
                  preferred_element_type=jnp.float32) + bqkv_ref[...]   # (tm, 3C)
    q_ref[...] = _bf16(qkv[:, :C])
    k_ref[...] = _bf16(qkv[:, C:2 * C])
    v_ref[...] = _bf16(qkv[:, 2 * C:])


def ln_qkv(x, ln_g, ln_b, wqkv_bf16, bqkv, *, tm=256):
    M, C = x.shape
    tm = _pick_tile(M, tm, 16)
    grid = (M // tm,)
    row_f32 = pl.BlockSpec((tm, C), lambda i: (i, 0))
    row_bf16 = pl.BlockSpec((tm, C), lambda i: (i, 0))
    vec = pl.BlockSpec((1, C), lambda i: (0, 0))
    cost = pl.CostEstimate(flops=6 * M * C * C, transcendentals=0,
                           bytes_accessed=4 * M * C + 2 * 3 * C * C + 2 * 3 * M * C)
    return pl.pallas_call(
        _ln_qkv_kernel,
        out_shape=(jax.ShapeDtypeStruct((M, C), jnp.bfloat16),) * 3,
        grid=grid,
        in_specs=[row_f32, vec, vec,
                  pl.BlockSpec((C, 3 * C), lambda i: (0, 0)),
                  pl.BlockSpec((1, 3 * C), lambda i: (0, 0))],
        out_specs=(row_bf16, row_bf16, row_bf16),
        compiler_params=pltpu.CompilerParams(
            dimension_semantics=("parallel",), vmem_limit_bytes=VMEM_LIMIT),
        cost_estimate=cost,
    )(x, ln_g.reshape(1, C), ln_b.reshape(1, C), wqkv_bf16, bqkv.reshape(1, 3 * C))


# ----------------------------------------------------------------------------
# Kernel 3: multi-head attention + output projection + residual, all fused.
#   Per head: s = (q_h) k_h^T  (Q pre-scaled), softmax, o_h = p v_h, then
#   immediately acc += o_h @ Wo[h-rows]  -> one lane-dense (tq, C) store of
#   residual + acc + bo.  No concat, no intermediate HBM traffic.
# ----------------------------------------------------------------------------

def _attn_oproj_kernel(q_ref, k_ref, v_ref, mb_ref, res_ref, wo_ref, bo_ref,
                       out_ref, *, num_heads):
    q = q_ref[...]                 # (tq, C) bf16, already scaled by dp_scale
    k = k_ref[...]                 # (N,  C) bf16
    v = v_ref[...]                 # (N,  C) bf16
    bias = mb_ref[...]             # (1,  N) f32 additive mask (0 or MASK_BIAS)
    tq = q.shape[0]
    C = q.shape[1]
    ch = C // num_heads
    acc = jnp.zeros((tq, C), jnp.float32)
    # TODO(synk): for ch < 128 a head-major padded layout would fill the MXU
    # better; for very long N a flash-style KV-chunked online softmax is needed
    # on v7x (64 MiB VMEM).  Moderate N / resident-KV is fine on v5e/v6e.
    for h in range(num_heads):     # static unrolled loop over heads
        lo = h * ch
        qh = q[:, lo:lo + ch]
        kh = k[:, lo:lo + ch]
        vh = v[:, lo:lo + ch]
        s = jax.lax.dot_general(qh, kh, (((1,), (1,)), ((), ())),
                                preferred_element_type=jnp.float32)   # (tq, N)
        s = s + bias
        s = s - jnp.max(s, axis=-1, keepdims=True)
        p = jnp.exp(s)
        inv = pl.reciprocal(jnp.sum(p, axis=-1, keepdims=True), approx=True)
        oh = jnp.dot(_bf16(p * inv), vh,
                     preferred_element_type=jnp.float32)              # (tq, ch)
        acc = acc + jnp.dot(_bf16(oh), wo_ref[lo:lo + ch, :],
                            preferred_element_type=jnp.float32)       # (tq, C)
    out_ref[...] = res_ref[...] + acc + bo_ref[...]


def attention_oproj(q, k, v, mask_bias, residual, wo_bf16, bo, *,
                    num_heads, tq=128):
    """q, k, v: (B, N, C) bf16; mask_bias: (B, 1, N) f32; residual: (B, N, C) f32."""
    B, N, C = q.shape
    tq = _pick_tile(N, tq, 16)
    grid = (B, N // tq)
    qo_spec = pl.BlockSpec((None, tq, C), lambda b, i: (b, i, 0))
    kv_spec = pl.BlockSpec((None, N, C), lambda b, i: (b, 0, 0))
    m_spec = pl.BlockSpec((None, 1, N), lambda b, i: (b, 0, 0))
    cost = pl.CostEstimate(
        flops=B * (4 * N * N * C + 2 * N * C * C),
        transcendentals=B * num_heads * N * N,
        bytes_accessed=2 * 3 * B * N * C + 8 * B * N * C + 2 * C * C)
    return pl.pallas_call(
        functools.partial(_attn_oproj_kernel, num_heads=num_heads),
        out_shape=jax.ShapeDtypeStruct((B, N, C), jnp.float32),
        grid=grid,
        in_specs=[qo_spec, kv_spec, kv_spec, m_spec, qo_spec,
                  pl.BlockSpec((C, C), lambda b, i: (0, 0)),
                  pl.BlockSpec((1, C), lambda b, i: (0, 0))],
        out_specs=qo_spec,
        compiler_params=pltpu.CompilerParams(
            dimension_semantics=("parallel", "parallel"),
            vmem_limit_bytes=VMEM_LIMIT),
        cost_estimate=cost,
    )(q, k, v, mask_bias, residual, wo_bf16, bo.reshape(1, C))


# ----------------------------------------------------------------------------
# Kernel 4: fused LN + MLP (Linear -> Mish -> Linear) + residual, with the
# widened dimension W tiled on an "arbitrary" grid axis (v7x-safe VMEM).
# ----------------------------------------------------------------------------

def _mlp_res_kernel(x_ref, g_ref, bln_ref, w1_ref, b1_ref, w2_ref, b2_ref,
                    out_ref, xn_ref, acc_ref):
    @pl.when(pl.program_id(1) == 0)
    def _():
        xn = _layernorm(x_ref[...], g_ref[...], bln_ref[...])   # f32 stats
        xn_ref[...] = _bf16(xn)
        acc_ref[...] = jnp.zeros_like(acc_ref)

    h = jnp.dot(xn_ref[...], w1_ref[...],
                preferred_element_type=jnp.float32) + b1_ref[...]   # (tm, tw)
    h = _mish(h)                                                    # f32
    acc_ref[...] += jnp.dot(_bf16(h), w2_ref[...],
                            preferred_element_type=jnp.float32)

    @pl.when(pl.program_id(1) == pl.num_programs(1) - 1)
    def _():
        out_ref[...] = x_ref[...] + acc_ref[...] + b2_ref[...]


def mlp_residual(x, g, bln, w1_bf16, b1, w2_bf16, b2, *, tm=256, tw=512):
    M, C = x.shape
    W = w1_bf16.shape[1]
    tm = _pick_tile(M, tm, 8)
    tw = _pick_tile(W, tw, 128)
    grid = (M // tm, W // tw)
    row = pl.BlockSpec((tm, C), lambda i, j: (i, 0))
    cvec = pl.BlockSpec((1, C), lambda i, j: (0, 0))
    cost = pl.CostEstimate(flops=4 * M * C * W, transcendentals=2 * M * W,
                           bytes_accessed=8 * M * C + 2 * 2 * C * W)
    return pl.pallas_call(
        _mlp_res_kernel,
        out_shape=jax.ShapeDtypeStruct((M, C), jnp.float32),
        grid=grid,
        in_specs=[row, cvec, cvec,
                  pl.BlockSpec((C, tw), lambda i, j: (0, j)),
                  pl.BlockSpec((1, tw), lambda i, j: (0, j)),
                  pl.BlockSpec((tw, C), lambda i, j: (j, 0)),
                  cvec],
        out_specs=row,
        scratch_shapes=[pltpu.VMEM((tm, C), jnp.bfloat16),
                        pltpu.VMEM((tm, C), jnp.float32)],
        compiler_params=pltpu.CompilerParams(
            dimension_semantics=("parallel", "arbitrary"),
            vmem_limit_bytes=VMEM_LIMIT),
        cost_estimate=cost,
    )(x, g.reshape(1, C), bln.reshape(1, C),
      w1_bf16, b1.reshape(1, W), w2_bf16, b2.reshape(1, C))


# ----------------------------------------------------------------------------
# Kernel 5: fused decoder chain dec1 -> dec2 -> dec3.
# Final output width is padded to a 128-lane multiple (lane-dense stores);
# the wrapper slices the padding off.
# ----------------------------------------------------------------------------

def _decoder_kernel(x_ref, w1_ref, b1_ref, w2_ref, b2_ref, w3_ref, b3_ref,
                    out_ref):
    y = jnp.dot(_bf16(x_ref[...]), w1_ref[...],
                preferred_element_type=jnp.float32) + b1_ref[...]
    y = jnp.dot(_bf16(y), w2_ref[...],
                preferred_element_type=jnp.float32) + b2_ref[...]
    out_ref[...] = jnp.dot(_bf16(y), w3_ref[...],
                           preferred_element_type=jnp.float32) + b3_ref[...]


def decoder(x, w1, b1, w2, b2, w3, b3, *, tm=512):
    M, C = x.shape
    c2, c4, co = w1.shape[1], w2.shape[1], w3.shape[1]
    co_pad = ((co + 127) // 128) * 128
    if co_pad != co:
        w3 = jnp.pad(w3, ((0, 0), (0, co_pad - co)))
        b3 = jnp.pad(b3, (0, co_pad - co))
    tm = _pick_tile(M, tm, 8)
    grid = (M // tm,)
    full = lambda i: (0, 0)
    out = pl.pallas_call(
        _decoder_kernel,
        out_shape=jax.ShapeDtypeStruct((M, co_pad), jnp.float32),
        grid=grid,
        in_specs=[pl.BlockSpec((tm, C), lambda i: (i, 0)),
                  pl.BlockSpec((C, c2), full), pl.BlockSpec((1, c2), full),
                  pl.BlockSpec((c2, c4), full), pl.BlockSpec((1, c4), full),
                  pl.BlockSpec((c4, co_pad), full), pl.BlockSpec((1, co_pad), full)],
        out_specs=pl.BlockSpec((tm, co_pad), lambda i: (i, 0)),
        compiler_params=pltpu.CompilerParams(
            dimension_semantics=("parallel",), vmem_limit_bytes=VMEM_LIMIT),
    )(x, _bf16(w1), b1.reshape(1, c2), _bf16(w2), b2.reshape(1, c4),
      _bf16(w3), b3.reshape(1, co_pad))
    return out[:, :co] if co_pad != co else out


# ----------------------------------------------------------------------------
# Parameter construction (deterministic, synthetic)
# ----------------------------------------------------------------------------

def _dense_params(key, d_in, d_out):
    kw, kb = jax.random.split(key)
    w = 0.05 * jax.random.normal(kw, (d_in, d_out), jnp.float32)
    b = 0.01 * jax.random.normal(kb, (d_out,), jnp.float32)
    return {"w": w, "b": b}


def init_model_head_params(key, num_layers, num_heads, in_channels,
                           num_channels, out_channels, widening_factor):
    keys = jax.random.split(key, 2 + num_layers)
    params = {"linear": _dense_params(keys[0], in_channels, num_channels)}

    layers = []
    for li in range(num_layers):
        lk = jax.random.split(keys[1 + li], 8)
        layers.append({
            "ln1_g": jnp.ones((num_channels,), jnp.float32),
            "ln1_b": jnp.zeros((num_channels,), jnp.float32),
            "q": _dense_params(lk[0], num_channels, num_channels),
            "k": _dense_params(lk[1], num_channels, num_channels),
            "v": _dense_params(lk[2], num_channels, num_channels),
            "o": _dense_params(lk[3], num_channels, num_channels),
            "ln2_g": jnp.ones((num_channels,), jnp.float32),
            "ln2_b": jnp.zeros((num_channels,), jnp.float32),
            "mlp1": _dense_params(lk[4], num_channels,
                                  widening_factor * num_channels),
            "mlp2": _dense_params(lk[5], widening_factor * num_channels,
                                  num_channels),
        })
    params["layers"] = layers

    dk = jax.random.split(keys[-1], 3)
    params["dec1"] = _dense_params(dk[0], num_channels, num_channels // 2)
    params["dec2"] = _dense_params(dk[1], num_channels // 2, num_channels // 4)
    params["dec3"] = _dense_params(dk[2], num_channels // 4, out_channels)
    return params


# ----------------------------------------------------------------------------
# Forward pass (thin JAX glue; all heavy lifting in the fused kernels above)
# ----------------------------------------------------------------------------

def model_head_forward(params, x, pad_mask, *, num_heads):
    B, N, Din = x.shape
    C = params["linear"]["w"].shape[1]
    ch = C // num_heads
    scale = ch ** (-0.5)
    # additive key-padding mask (True => padding token), kept in f32
    mask_bias = jnp.where(pad_mask, MASK_BIAS, 0.0).astype(jnp.float32)
    mask_bias = mask_bias.reshape(B, 1, N)

    # input projection (tiled matmul, bf16 weight)
    h = linear(x.reshape(B * N, Din), _bf16(params["linear"]["w"]),
               params["linear"]["b"])                               # (B*N, C) f32

    for lp in params["layers"]:
        # ---- residual self-attention (pre layer-norm) ----
        # dp_scale folded into the Q slice of the fused QKV weight/bias.
        wqkv = _bf16(jnp.concatenate(
            [lp["q"]["w"] * scale, lp["k"]["w"], lp["v"]["w"]], axis=1))
        bqkv = jnp.concatenate(
            [lp["q"]["b"] * scale, lp["k"]["b"], lp["v"]["b"]])
        q, k, v = ln_qkv(h, lp["ln1_g"], lp["ln1_b"], wqkv, bqkv)   # (B*N, C) bf16
        h = attention_oproj(q.reshape(B, N, C), k.reshape(B, N, C),
                            v.reshape(B, N, C), mask_bias,
                            h.reshape(B, N, C),
                            _bf16(lp["o"]["w"]), lp["o"]["b"],
                            num_heads=num_heads)                    # (B, N, C)
        h = h.reshape(B * N, C)

        # ---- residual MLP (LN -> Linear -> Mish -> Linear) ----
        h = mlp_residual(h, lp["ln2_g"], lp["ln2_b"],
                         _bf16(lp["mlp1"]["w"]), lp["mlp1"]["b"],
                         _bf16(lp["mlp2"]["w"]), lp["mlp2"]["b"])   # h + mlp(ln(h))

    # flatten(0, 1) then fused decoder (no activations between linears)
    return decoder(h, params["dec1"]["w"], params["dec1"]["b"],
                   params["dec2"]["w"], params["dec2"]["b"],
                   params["dec3"]["w"], params["dec3"]["b"])        # (B*N, out)


# ----------------------------------------------------------------------------
if __name__ == "__main__":
    # small config consistent with ModelHead(__init__)
    num_layers = 2
    num_heads = 4
    in_channels = 16
    num_channels = 32
    out_channels = 8
    widening_factor = 1
    B, N = 2, 8

    key = jax.random.PRNGKey(0)
    kp, kx = jax.random.split(key)
    params = init_model_head_params(kp, num_layers, num_heads, in_channels,
                                    num_channels, out_channels,
                                    widening_factor)
    x = jax.random.normal(kx, (B, N, in_channels), jnp.float32)
    # boolean pad mask: True => padding token (last two positions of batch 1)
    pad_mask = jnp.zeros((B, N), dtype=bool).at[1, -2:].set(True)

    fwd = jax.jit(functools.partial(model_head_forward, num_heads=num_heads))
    out = jax.block_until_ready(fwd(params, x, pad_mask))
    assert out.shape == (B * N, out_channels)
    assert bool(jnp.all(jnp.isfinite(out)))
    print("KERNEL_OK")
</pallas_src>

<mosaic_0001>
module attributes {stable_mosaic.version = 11 : i64} {
  func.func @_matmul_kernel(%arg0: i32, %arg1: i32, %arg2: i32, %arg3: memref<16x16xf32, #tpu.memory_space<vmem>>, %arg4: memref<16x32xbf16, #tpu.memory_space<vmem>>, %arg5: memref<1x32xf32, #tpu.memory_space<vmem>>, %arg6: memref<16x32xf32, #tpu.memory_space<vmem>>, %arg7: memref<16x32xf32, #tpu.memory_space<vmem>>) attributes {dimension_semantics = [#tpu.dimension_semantics<parallel>, #tpu.dimension_semantics<parallel>, #tpu.dimension_semantics<arbitrary>], iteration_bounds = array<i64: 1, 1, 1>, scalar_prefetch = 0 : i64, scratch_operands = 1 : i64, tpu.core_type = #tpu.core_type<tc>, window_params = [{transform_indices = @transform_0, window_bounds = array<i64: 16, 16>}, {transform_indices = @transform_1, window_bounds = array<i64: 16, 32>}, {transform_indices = @transform_2, window_bounds = array<i64: 1, 32>}, {transform_indices = @transform_3, window_bounds = array<i64: 16, 32>}]} {
    %c0_i32 = arith.constant 0 : i32
    %0 = arith.cmpi eq, %arg2, %c0_i32 : i32
    %1 = arith.extui %0 : i1 to i32
    %c0_i32_0 = arith.constant 0 : i32
    %2 = arith.cmpi ne, %1, %c0_i32_0 : i32
    scf.if %2 {
      %cst_10 = arith.constant 0.000000e+00 : f32
      %13 = vector.broadcast %cst_10 : f32 to vector<16x32xf32>
      %c0_11 = arith.constant 0 : index
      %c0_12 = arith.constant 0 : index
      %14 = vector.load %arg7[%c0_11, %c0_12] : memref<16x32xf32, #tpu.memory_space<vmem>>, vector<16x32xf32>
      tpu.vector_store %arg7[%c0_11, %c0_12], %13 {strides = array<i32>} : memref<16x32xf32, #tpu.memory_space<vmem>>, vector<16x32xf32>,
    } else {
    }
    %c0 = arith.constant 0 : index
    %c0_1 = arith.constant 0 : index
    %3 = vector.load %arg7[%c0, %c0_1] : memref<16x32xf32, #tpu.memory_space<vmem>>, vector<16x32xf32>
    %c0_2 = arith.constant 0 : index
    %c0_3 = arith.constant 0 : index
    %4 = vector.load %arg3[%c0_2, %c0_3] : memref<16x16xf32, #tpu.memory_space<vmem>>, vector<16x16xf32>
    %5 = arith.truncf %4 : vector<16x16xf32> to vector<16x16xbf16>
    %c0_4 = arith.constant 0 : index
    %c0_5 = arith.constant 0 : index
    %6 = vector.load %arg4[%c0_4, %c0_5] : memref<16x32xbf16, #tpu.memory_space<vmem>>, vector<16x32xbf16>
    %cst = arith.constant dense<0.000000e+00> : vector<16x32xf32>
    %7 = tpu.matmul %5, %6, %cst {dimension_numbers = #tpu.dot_dimension_numbers<[1], [0], [0], [1], [0, 0, 1, 1], [], []>} : vector<16x16xbf16>, vector<16x32xbf16>, vector<16x32xf32> -> vector<16x32xf32>
    %8 = arith.addf %3, %7 : vector<16x32xf32>
    %c0_6 = arith.constant 0 : index
    %c0_7 = arith.constant 0 : index
    %9 = vector.load %arg7[%c0_6, %c0_7] : memref<16x32xf32, #tpu.memory_space<vmem>>, vector<16x32xf32>
    tpu.vector_store %arg7[%c0_6, %c0_7], %8 {strides = array<i32>} : memref<16x32xf32, #tpu.memory_space<vmem>>, vector<16x32xf32>,
    %c0_i32_8 = arith.constant 0 : i32
    %10 = arith.cmpi eq, %arg2, %c0_i32_8 : i32
    %11 = arith.extui %10 : i1 to i32
    %c0_i32_9 = arith.constant 0 : i32
    %12 = arith.cmpi ne, %11, %c0_i32_9 : i32
    scf.if %12 {
      %c0_10 = arith.constant 0 : index
      %c0_11 = arith.constant 0 : index
      %13 = vector.load %arg7[%c0_10, %c0_11] : memref<16x32xf32, #tpu.memory_space<vmem>>, vector<16x32xf32>
      %c0_12 = arith.constant 0 : index
      %c0_13 = arith.constant 0 : index
      %14 = vector.load %arg5[%c0_12, %c0_13] : memref<1x32xf32, #tpu.memory_space<vmem>>, vector<1x32xf32>
      %15 = vector.broadcast %14 : vector<1x32xf32> to vector<16x32xf32>
      %16 = arith.addf %13, %15 : vector<16x32xf32>
      %c0_14 = arith.constant 0 : index
      %c0_15 = arith.constant 0 : index
      %17 = vector.load %arg6[%c0_14, %c0_15] : memref<16x32xf32, #tpu.memory_space<vmem>>, vector<16x32xf32>
      tpu.vector_store %arg6[%c0_14, %c0_15], %16 {strides = array<i32>} : memref<16x32xf32, #tpu.memory_space<vmem>>, vector<16x32xf32>,
    } else {
    }
    return
  }
  func.func @transform_0(%arg0: i32, %arg1: i32, %arg2: i32) -> (i32, i32) {
    %c0_i32 = arith.constant 0 : i32
    return %arg0, %arg2 : i32, i32
  }
  func.func @transform_1(%arg0: i32, %arg1: i32, %arg2: i32) -> (i32, i32) {
    %c0_i32 = arith.constant 0 : i32
    return %arg2, %arg1 : i32, i32
  }
  func.func @transform_2(%arg0: i32, %arg1: i32, %arg2: i32) -> (i32, i32) {
    %c0_i32 = arith.constant 0 : i32
    %c0_i32_0 = arith.constant 0 : i32
    return %c0_i32, %arg1 : i32, i32
  }
  func.func @transform_3(%arg0: i32, %arg1: i32, %arg2: i32) -> (i32, i32) {
    %c0_i32 = arith.constant 0 : i32
    return %arg0, %arg1 : i32, i32
  }
}

module attributes {stable_mosaic.version = 11 : i64} {
  func.func @_ln_qkv_kernel(%arg0: i32, %arg1: memref<16x32xf32, #tpu.memory_space<vmem>>, %arg2: memref<1x32xf32, #tpu.memory_space<vmem>>, %arg3: memref<1x32xf32, #tpu.memory_space<vmem>>, %arg4: memref<32x96xbf16, #tpu.memory_space<vmem>>, %arg5: memref<1x96xf32, #tpu.memory_space<vmem>>, %arg6: memref<16x32xbf16, #tpu.memory_space<vmem>>, %arg7: memref<16x32xbf16, #tpu.memory_space<vmem>>, %arg8: memref<16x32xbf16, #tpu.memory_space<vmem>>) attributes {dimension_semantics = [#tpu.dimension_semantics<parallel>], iteration_bounds = array<i64: 1>, scalar_prefetch = 0 : i64, scratch_operands = 0 : i64, tpu.core_type = #tpu.core_type<tc>, window_params = [{transform_indices = @transform_0, window_bounds = array<i64: 16, 32>}, {pipeline_mode = #tpu.pipeline_mode<synchronous>, transform_indices = @transform_1, window_bounds = array<i64: 1, 32>}, {pipeline_mode = #tpu.pipeline_mode<synchronous>, transform_indices = @transform_2, window_bounds = array<i64: 1, 32>}, {pipeline_mode = #tpu.pipeline_mode<synchronous>, transform_indices = @transform_3, window_bounds = array<i64: 32, 96>}, {pipeline_mode = #tpu.pipeline_mode<synchronous>, transform_indices = @transform_4, window_bounds = array<i64: 1, 96>}, {transform_indices = @transform_5, window_bounds = array<i64: 16, 32>}, {transform_indices = @transform_6, window_bounds = array<i64: 16, 32>}, {transform_indices = @transform_7, window_bounds = array<i64: 16, 32>}]} {
    %c0 = arith.constant 0 : index
    %c0_0 = arith.constant 0 : index
    %0 = vector.load %arg1[%c0, %c0_0] : memref<16x32xf32, #tpu.memory_space<vmem>>, vector<16x32xf32>
    %c0_1 = arith.constant 0 : index
    %c0_2 = arith.constant 0 : index
    %1 = vector.load %arg2[%c0_1, %c0_2] : memref<1x32xf32, #tpu.memory_space<vmem>>, vector<1x32xf32>
    %c0_3 = arith.constant 0 : index
    %c0_4 = arith.constant 0 : index
    %2 = vector.load %arg3[%c0_3, %c0_4] : memref<1x32xf32, #tpu.memory_space<vmem>>, vector<1x32xf32>
    %cst = arith.constant dense<0.000000e+00> : vector<16xf32>
    %3 = vector.multi_reduction <add>, %0, %cst [1] : vector<16x32xf32> to vector<16xf32>
    %4 = vector.shape_cast %3 : vector<16xf32> to vector<16x1xf32>
    %cst_5 = arith.constant 3.200000e+01 : f32
    %5 = vector.broadcast %cst_5 : f32 to vector<16x1xf32>
    %6 = arith.divf %4, %5 : vector<16x1xf32>
    %7 = vector.broadcast %6 : vector<16x1xf32> to vector<16x32xf32>
    %8 = arith.subf %0, %7 : vector<16x32xf32>
    %9 = arith.mulf %8, %8 : vector<16x32xf32>
    %cst_6 = arith.constant dense<0.000000e+00> : vector<16xf32>
    %10 = vector.multi_reduction <add>, %9, %cst_6 [1] : vector<16x32xf32> to vector<16xf32>
    %11 = vector.shape_cast %10 : vector<16xf32> to vector<16x1xf32>
    %cst_7 = arith.constant 3.200000e+01 : f32
    %12 = vector.broadcast %cst_7 : f32 to vector<16x1xf32>
    %13 = arith.divf %11, %12 : vector<16x1xf32>
    %cst_8 = arith.constant 9.99999974E-6 : f32
    %14 = vector.broadcast %cst_8 : f32 to vector<16x1xf32>
    %15 = arith.addf %13, %14 : vector<16x1xf32>
    %16 = math.rsqrt %15 : vector<16x1xf32>
    %17 = vector.broadcast %16 : vector<16x1xf32> to vector<16x32xf32>
    %18 = arith.mulf %8, %17 : vector<16x32xf32>
    %19 = vector.broadcast %1 : vector<1x32xf32> to vector<16x32xf32>
    %20 = arith.mulf %18, %19 : vector<16x32xf32>
    %21 = vector.broadcast %2 : vector<1x32xf32> to vector<16x32xf32>
    %22 = arith.addf %20, %21 : vector<16x32xf32>
    %23 = arith.truncf %22 : vector<16x32xf32> to vector<16x32xbf16>
    %c0_9 = arith.constant 0 : index
    %c0_10 = arith.constant 0 : index
    %24 = vector.load %arg4[%c0_9, %c0_10] : memref<32x96xbf16, #tpu.memory_space<vmem>>, vector<32x96xbf16>
    %cst_11 = arith.constant dense<0.000000e+00> : vector<16x96xf32>
    %25 = tpu.matmul %23, %24, %cst_11 {dimension_numbers = #tpu.dot_dimension_numbers<[1], [0], [0], [1], [0, 0, 1, 1], [], []>} : vector<16x32xbf16>, vector<32x96xbf16>, vector<16x96xf32> -> vector<16x96xf32>
    %c0_12 = arith.constant 0 : index
    %c0_13 = arith.constant 0 : index
    %26 = vector.load %arg5[%c0_12, %c0_13] : memref<1x96xf32, #tpu.memory_space<vmem>>, vector<1x96xf32>
    %27 = vector.broadcast %26 : vector<1x96xf32> to vector<16x96xf32>
    %28 = arith.addf %25, %27 : vector<16x96xf32>
    %29 = vector.extract_strided_slice %28 {offsets = [0, 0], sizes = [16, 32], strides = [1, 1]} : vector<16x96xf32> to vector<16x32xf32>
    %30 = arith.truncf %29 : vector<16x32xf32> to vector<16x32xbf16>
    %c0_14 = arith.constant 0 : index
    %c0_15 = arith.constant 0 : index
    %31 = vector.load %arg6[%c0_14, %c0_15] : memref<16x32xbf16, #tpu.memory_space<vmem>>, vector<16x32xbf16>
    tpu.vector_store %arg6[%c0_14, %c0_15], %30 {strides = array<i32>} : memref<16x32xbf16, #tpu.memory_space<vmem>>, vector<16x32xbf16>,
    %32 = vector.extract_strided_slice %28 {offsets = [0, 32], sizes = [16, 32], strides = [1, 1]} : vector<16x96xf32> to vector<16x32xf32>
    %33 = arith.truncf %32 : vector<16x32xf32> to vector<16x32xbf16>
    %c0_16 = arith.constant 0 : index
    %c0_17 = arith.constant 0 : index
    %34 = vector.load %arg7[%c0_16, %c0_17] : memref<16x32xbf16, #tpu.memory_space<vmem>>, vector<16x32xbf16>
    tpu.vector_store %arg7[%c0_16, %c0_17], %33 {strides = array<i32>} : memref<16x32xbf16, #tpu.memory_space<vmem>>, vector<16x32xbf16>,
    %35 = vector.extract_strided_slice %28 {offsets = [0, 64], sizes = [16, 32], strides = [1, 1]} : vector<16x96xf32> to vector<16x32xf32>
    %36 = arith.truncf %35 : vector<16x32xf32> to vector<16x32xbf16>
    %c0_18 = arith.constant 0 : index
    %c0_19 = arith.constant 0 : index
    %37 = vector.load %arg8[%c0_18, %c0_19] : memref<16x32xbf16, #tpu.memory_space<vmem>>, vector<16x32xbf16>
    tpu.vector_store %arg8[%c0_18, %c0_19], %36 {strides = array<i32>} : memref<16x32xbf16, #tpu.memory_space<vmem>>, vector<16x32xbf16>,
    return
  }
  func.func @transform_0(%arg0: i32) -> (i32, i32) {
    %c0_i32 = arith.constant 0 : i32
    %c0_i32_0 = arith.constant 0 : i32
    return %arg0, %c0_i32 : i32, i32
  }
  func.func @transform_1(%arg0: i32) -> (i32, i32) {
    %c0_i32 = arith.constant 0 : i32
    %c0_i32_0 = arith.constant 0 : i32
    %c0_i32_1 = arith.constant 0 : i32
    return %c0_i32, %c0_i32_0 : i32, i32
  }
  func.func @transform_2(%arg0: i32) -> (i32, i32) {
    %c0_i32 = arith.constant 0 : i32
    %c0_i32_0 = arith.constant 0 : i32
    %c0_i32_1 = arith.constant 0 : i32
    return %c0_i32, %c0_i32_0 : i32, i32
  }
  func.func @transform_3(%arg0: i32) -> (i32, i32) {
    %c0_i32 = arith.constant 0 : i32
    %c0_i32_0 = arith.constant 0 : i32
    %c0_i32_1 = arith.constant 0 : i32
    return %c0_i32, %c0_i32_0 : i32, i32
  }
  func.func @transform_4(%arg0: i32) -> (i32, i32) {
    %c0_i32 = arith.constant 0 : i32
    %c0_i32_0 = arith.constant 0 : i32
    %c0_i32_1 = arith.constant 0 : i32
    return %c0_i32, %c0_i32_0 : i32, i32
  }
  func.func @transform_5(%arg0: i32) -> (i32, i32) {
    %c0_i32 = arith.constant 0 : i32
    %c0_i32_0 = arith.constant 0 : i32
    return %arg0, %c0_i32 : i32, i32
  }
  func.func @transform_6(%arg0: i32) -> (i32, i32) {
    %c0_i32 = arith.constant 0 : i32
    %c0_i32_0 = arith.constant 0 : i32
    return %arg0, %c0_i32 : i32, i32
  }
  func.func @transform_7(%arg0: i32) -> (i32, i32) {
    %c0_i32 = arith.constant 0 : i32
    %c0_i32_0 = arith.constant 0 : i32
    return %arg0, %c0_i32 : i32, i32
  }
}

module attributes {stable_mosaic.version = 11 : i64} {
  func.func @_mlp_res_kernel(%arg0: i32, %arg1: i32, %arg2: memref<16x32xf32, #tpu.memory_space<vmem>>, %arg3: memref<1x32xf32, #tpu.memory_space<vmem>>, %arg4: memref<1x32xf32, #tpu.memory_space<vmem>>, %arg5: memref<32x32xbf16, #tpu.memory_space<vmem>>, %arg6: memref<1x32xf32, #tpu.memory_space<vmem>>, %arg7: memref<32x32xbf16, #tpu.memory_space<vmem>>, %arg8: memref<1x32xf32, #tpu.memory_space<vmem>>, %arg9: memref<16x32xf32, #tpu.memory_space<vmem>>, %arg10: memref<16x32xbf16, #tpu.memory_space<vmem>>, %arg11: memref<16x32xf32, #tpu.memory_space<vmem>>) attributes {dimension_semantics = [#tpu.dimension_semantics<parallel>, #tpu.dimension_semantics<arbitrary>], iteration_bounds = array<i64: 1, 1>, scalar_prefetch = 0 : i64, scratch_operands = 2 : i64, tpu.core_type = #tpu.core_type<tc>, window_params = [{transform_indices = @transform_0, window_bounds = array<i64: 16, 32>}, {pipeline_mode = #tpu.pipeline_mode<synchronous>, transform_indices = @transform_1, window_bounds = array<i64: 1, 32>}, {pipeline_mode = #tpu.pipeline_mode<synchronous>, transform_indices = @transform_2, window_bounds = array<i64: 1, 32>}, {transform_indices = @transform_3, window_bounds = array<i64: 32, 32>}, {transform_indices = @transform_4, window_bounds = array<i64: 1, 32>}, {transform_indices = @transform_5, window_bounds = array<i64: 32, 32>}, {pipeline_mode = #tpu.pipeline_mode<synchronous>, transform_indices = @transform_6, window_bounds = array<i64: 1, 32>}, {transform_indices = @transform_7, window_bounds = array<i64: 16, 32>}]} {
    %c0_i32 = arith.constant 0 : i32
    %0 = arith.cmpi eq, %arg1, %c0_i32 : i32
    %1 = arith.extui %0 : i1 to i32
    %c0_i32_0 = arith.constant 0 : i32
    %2 = arith.cmpi ne, %1, %c0_i32_0 : i32
    scf.if %2 {
      %c0_17 = arith.constant 0 : index
      %c0_18 = arith.constant 0 : index
      %28 = vector.load %arg2[%c0_17, %c0_18] : memref<16x32xf32, #tpu.memory_space<vmem>>, vector<16x32xf32>
      %c0_19 = arith.constant 0 : index
      %c0_20 = arith.constant 0 : index
      %29 = vector.load %arg3[%c0_19, %c0_20] : memref<1x32xf32, #tpu.memory_space<vmem>>, vector<1x32xf32>
      %c0_21 = arith.constant 0 : index
      %c0_22 = arith.constant 0 : index
      %30 = vector.load %arg4[%c0_21, %c0_22] : memref<1x32xf32, #tpu.memory_space<vmem>>, vector<1x32xf32>
      %cst_23 = arith.constant dense<0.000000e+00> : vector<16xf32>
      %31 = vector.multi_reduction <add>, %28, %cst_23 [1] : vector<16x32xf32> to vector<16xf32>
      %32 = vector.shape_cast %31 : vector<16xf32> to vector<16x1xf32>
      %cst_24 = arith.constant 3.200000e+01 : f32
      %33 = vector.broadcast %cst_24 : f32 to vector<16x1xf32>
      %34 = arith.divf %32, %33 : vector<16x1xf32>
      %35 = vector.broadcast %34 : vector<16x1xf32> to vector<16x32xf32>
      %36 = arith.subf %28, %35 : vector<16x32xf32>
      %37 = arith.mulf %36, %36 : vector<16x32xf32>
      %cst_25 = arith.constant dense<0.000000e+00> : vector<16xf32>
      %38 = vector.multi_reduction <add>, %37, %cst_25 [1] : vector<16x32xf32> to vector<16xf32>
      %39 = vector.shape_cast %38 : vector<16xf32> to vector<16x1xf32>
      %cst_26 = arith.constant 3.200000e+01 : f32
      %40 = vector.broadcast %cst_26 : f32 to vector<16x1xf32>
      %41 = arith.divf %39, %40 : vector<16x1xf32>
      %cst_27 = arith.constant 9.99999974E-6 : f32
      %42 = vector.broadcast %cst_27 : f32 to vector<16x1xf32>
      %43 = arith.addf %41, %42 : vector<16x1xf32>
      %44 = math.rsqrt %43 : vector<16x1xf32>
      %45 = vector.broadcast %44 : vector<16x1xf32> to vector<16x32xf32>
      %46 = arith.mulf %36, %45 : vector<16x32xf32>
      %47 = vector.broadcast %29 : vector<1x32xf32> to vector<16x32xf32>
      %48 = arith.mulf %46, %47 : vector<16x32xf32>
      %49 = vector.broadcast %30 : vector<1x32xf32> to vector<16x32xf32>
      %50 = arith.addf %48, %49 : vector<16x32xf32>
      %51 = arith.truncf %50 : vector<16x32xf32> to vector<16x32xbf16>
      %c0_28 = arith.constant 0 : index
      %c0_29 = arith.constant 0 : index
      %52 = vector.load %arg10[%c0_28, %c0_29] : memref<16x32xbf16, #tpu.memory_space<vmem>>, vector<16x32xbf16>
      tpu.vector_store %arg10[%c0_28, %c0_29], %51 {strides = array<i32>} : memref<16x32xbf16, #tpu.memory_space<vmem>>, vector<16x32xbf16>,
      %cst_30 = arith.constant 0.000000e+00 : f32
      %53 = vector.broadcast %cst_30 : f32 to vector<16x32xf32>
      %c0_31 = arith.constant 0 : index
      %c0_32 = arith.constant 0 : index
      %54 = vector.load %arg11[%c0_31, %c0_32] : memref<16x32xf32, #tpu.memory_space<vmem>>, vector<16x32xf32>
      tpu.vector_store %arg11[%c0_31, %c0_32], %53 {strides = array<i32>} : memref<16x32xf32, #tpu.memory_space<vmem>>, vector<16x32xf32>,
    } else {
    }
    %c0 = arith.constant 0 : index
    %c0_1 = arith.constant 0 : index
    %3 = vector.load %arg10[%c0, %c0_1] : memref<16x32xbf16, #tpu.memory_space<vmem>>, vector<16x32xbf16>
    %c0_2 = arith.constant 0 : index
    %c0_3 = arith.constant 0 : index
    %4 = vector.load %arg5[%c0_2, %c0_3] : memref<32x32xbf16, #tpu.memory_space<vmem>>, vector<32x32xbf16>
    %cst = arith.constant dense<0.000000e+00> : vector<16x32xf32>
    %5 = tpu.matmul %3, %4, %cst {dimension_numbers = #tpu.dot_dimension_numbers<[1], [0], [0], [1], [0, 0, 1, 1], [], []>} : vector<16x32xbf16>, vector<32x32xbf16>, vector<16x32xf32> -> vector<16x32xf32>
    %c0_4 = arith.constant 0 : index
    %c0_5 = arith.constant 0 : index
    %6 = vector.load %arg6[%c0_4, %c0_5] : memref<1x32xf32, #tpu.memory_space<vmem>>, vector<1x32xf32>
    %7 = vector.broadcast %6 : vector<1x32xf32> to vector<16x32xf32>
    %8 = arith.addf %5, %7 : vector<16x32xf32>
    %cst_6 = arith.constant 0.000000e+00 : f32
    %9 = vector.broadcast %cst_6 : f32 to vector<16x32xf32>
    %10 = arith.maximumf %8, %9 : vector<16x32xf32>
    %11 = math.absf %8 : vector<16x32xf32>
    %cst_7 = arith.constant 0.000000e+00 : f32
    %12 = vector.broadcast %cst_7 : f32 to vector<16x32xf32>
    %13 = arith.subf %12, %11 : vector<16x32xf32>
    %14 = math.exp %13 : vector<16x32xf32>
    %15 = math.log1p %14 : vector<16x32xf32>
    %16 = arith.addf %10, %15 : vector<16x32xf32>
    %17 = math.tanh %16 : vector<16x32xf32>
    %18 = arith.mulf %8, %17 : vector<16x32xf32>
    %c0_8 = arith.constant 0 : index
    %c0_9 = arith.constant 0 : index
    %19 = vector.load %arg11[%c0_8, %c0_9] : memref<16x32xf32, #tpu.memory_space<vmem>>, vector<16x32xf32>
    %20 = arith.truncf %18 : vector<16x32xf32> to vector<16x32xbf16>
    %c0_10 = arith.constant 0 : index
    %c0_11 = arith.constant 0 : index
    %21 = vector.load %arg7[%c0_10, %c0_11] : memref<32x32xbf16, #tpu.memory_space<vmem>>, vector<32x32xbf16>
    %cst_12 = arith.constant dense<0.000000e+00> : vector<16x32xf32>
    %22 = tpu.matmul %20, %21, %cst_12 {dimension_numbers = #tpu.dot_dimension_numbers<[1], [0], [0], [1], [0, 0, 1, 1], [], []>} : vector<16x32xbf16>, vector<32x32xbf16>, vector<16x32xf32> -> vector<16x32xf32>
    %23 = arith.addf %19, %22 : vector<16x32xf32>
    %c0_13 = arith.constant 0 : index
    %c0_14 = arith.constant 0 : index
    %24 = vector.load %arg11[%c0_13, %c0_14] : memref<16x32xf32, #tpu.memory_space<vmem>>, vector<16x32xf32>
    tpu.vector_store %arg11[%c0_13, %c0_14], %23 {strides = array<i32>} : memref<16x32xf32, #tpu.memory_space<vmem>>, vector<16x32xf32>,
    %c0_i32_15 = arith.constant 0 : i32
    %25 = arith.cmpi eq, %arg1, %c0_i32_15 : i32
    %26 = arith.extui %25 : i1 to i32
    %c0_i32_16 = arith.constant 0 : i32
    %27 = arith.cmpi ne, %26, %c0_i32_16 : i32
    scf.if %27 {
      %c0_17 = arith.constant 0 : index
      %c0_18 = arith.constant 0 : index
      %28 = vector.load %arg2[%c0_17, %c0_18] : memref<16x32xf32, #tpu.memory_space<vmem>>, vector<16x32xf32>
      %c0_19 = arith.constant 0 : index
      %c0_20 = arith.constant 0 : index
      %29 = vector.load %arg11[%c0_19, %c0_20] : memref<16x32xf32, #tpu.memory_space<vmem>>, vector<16x32xf32>
      %30 = arith.addf %28, %29 : vector<16x32xf32>
      %c0_21 = arith.constant 0 : index
      %c0_22 = arith.constant 0 : index
      %31 = vector.load %arg8[%c0_21, %c0_22] : memref<1x32xf32, #tpu.memory_space<vmem>>, vector<1x32xf32>
      %32 = vector.broadcast %31 : vector<1x32xf32> to vector<16x32xf32>
      %33 = arith.addf %30, %32 : vector<16x32xf32>
      %c0_23 = arith.constant 0 : index
      %c0_24 = arith.constant 0 : index
      %34 = vector.load %arg9[%c0_23, %c0_24] : memref<16x32xf32, #tpu.memory_space<vmem>>, vector<16x32xf32>
      tpu.vector_store %arg9[%c0_23, %c0_24], %33 {strides = array<i32>} : memref<16x32xf32, #tpu.memory_space<vmem>>, vector<16x32xf32>,
    } else {
    }
    return
  }
  func.func @transform_0(%arg0: i32, %arg1: i32) -> (i32, i32) {
    %c0_i32 = arith.constant 0 : i32
    %c0_i32_0 = arith.constant 0 : i32
    return %arg0, %c0_i32 : i32, i32
  }
  func.func @transform_1(%arg0: i32, %arg1: i32) -> (i32, i32) {
    %c0_i32 = arith.constant 0 : i32
    %c0_i32_0 = arith.constant 0 : i32
    %c0_i32_1 = arith.constant 0 : i32
    return %c0_i32, %c0_i32_0 : i32, i32
  }
  func.func @transform_2(%arg0: i32, %arg1: i32) -> (i32, i32) {
    %c0_i32 = arith.constant 0 : i32
    %c0_i32_0 = arith.constant 0 : i32
    %c0_i32_1 = arith.constant 0 : i32
    return %c0_i32, %c0_i32_0 : i32, i32
  }
  func.func @transform_3(%arg0: i32, %arg1: i32) -> (i32, i32) {
    %c0_i32 = arith.constant 0 : i32
    %c0_i32_0 = arith.constant 0 : i32
    return %c0_i32, %arg1 : i32, i32
  }
  func.func @transform_4(%arg0: i32, %arg1: i32) -> (i32, i32) {
    %c0_i32 = arith.constant 0 : i32
    %c0_i32_0 = arith.constant 0 : i32
    return %c0_i32, %arg1 : i32, i32
  }
  func.func @transform_5(%arg0: i32, %arg1: i32) -> (i32, i32) {
    %c0_i32 = arith.constant 0 : i32
    %c0_i32_0 = arith.constant 0 : i32
    return %arg1, %c0_i32 : i32, i32
  }
  func.func @transform_6(%arg0: i32, %arg1: i32) -> (i32, i32) {
    %c0_i32 = arith.constant 0 : i32
    %c0_i32_0 = arith.constant 0 : i32
    %c0_i32_1 = arith.constant 0 : i32
    return %c0_i32, %c0_i32_0 : i32, i32
  }
  func.func @transform_7(%arg0: i32, %arg1: i32) -> (i32, i32) {
    %c0_i32 = arith.constant 0 : i32
    %c0_i32_0 = arith.constant 0 : i32
    return %arg0, %c0_i32 : i32, i32
  }
}

module attributes {stable_mosaic.version = 11 : i64} {
  func.func @_attn_oproj_kernel(%arg0: i32, %arg1: i32, %arg2: memref<1x8x32xbf16, #tpu.memory_space<vmem>>, %arg3: memref<1x8x32xbf16, #tpu.memory_space<vmem>>, %arg4: memref<1x8x32xbf16, #tpu.memory_space<vmem>>, %arg5: memref<1x1x8xf32, #tpu.memory_space<vmem>>, %arg6: memref<1x8x32xf32, #tpu.memory_space<vmem>>, %arg7: memref<32x32xbf16, #tpu.memory_space<vmem>>, %arg8: memref<1x32xf32, #tpu.memory_space<vmem>>, %arg9: memref<1x8x32xf32, #tpu.memory_space<vmem>>) attributes {dimension_semantics = [#tpu.dimension_semantics<parallel>, #tpu.dimension_semantics<parallel>], iteration_bounds = array<i64: 2, 1>, scalar_prefetch = 0 : i64, scratch_operands = 0 : i64, tpu.core_type = #tpu.core_type<tc>, window_params = [{transform_indices = @transform_0, window_bounds = array<i64: 1, 8, 32>}, {transform_indices = @transform_1, window_bounds = array<i64: 1, 8, 32>}, {transform_indices = @transform_2, window_bounds = array<i64: 1, 8, 32>}, {transform_indices = @transform_3, window_bounds = array<i64: 1, 1, 8>}, {transform_indices = @transform_4, window_bounds = array<i64: 1, 8, 32>}, {pipeline_mode = #tpu.pipeline_mode<synchronous>, transform_indices = @transform_5, window_bounds = array<i64: 32, 32>}, {pipeline_mode = #tpu.pipeline_mode<synchronous>, transform_indices = @transform_6, window_bounds = array<i64: 1, 32>}, {transform_indices = @transform_7, window_bounds = array<i64: 1, 8, 32>}]} {
    %c0 = arith.constant 0 : index
    %c0_0 = arith.constant 0 : index
    %c0_1 = arith.constant 0 : index
    %0 = vector.load %arg2[%c0, %c0_0, %c0_1] : memref<1x8x32xbf16, #tpu.memory_space<vmem>>, vector<1x8x32xbf16>
    %1 = vector.shape_cast %0 : vector<1x8x32xbf16> to vector<8x32xbf16>
    %c0_2 = arith.constant 0 : index
    %c0_3 = arith.constant 0 : index
    %c0_4 = arith.constant 0 : index
    %2 = vector.load %arg3[%c0_2, %c0_3, %c0_4] : memref<1x8x32xbf16, #tpu.memory_space<vmem>>, vector<1x8x32xbf16>
    %3 = vector.shape_cast %2 : vector<1x8x32xbf16> to vector<8x32xbf16>
    %c0_5 = arith.constant 0 : index
    %c0_6 = arith.constant 0 : index
    %c0_7 = arith.constant 0 : index
    %4 = vector.load %arg4[%c0_5, %c0_6, %c0_7] : memref<1x8x32xbf16, #tpu.memory_space<vmem>>, vector<1x8x32xbf16>
    %5 = vector.shape_cast %4 : vector<1x8x32xbf16> to vector<8x32xbf16>
    %c0_8 = arith.constant 0 : index
    %c0_9 = arith.constant 0 : index
    %c0_10 = arith.constant 0 : index
    %6 = vector.load %arg5[%c0_8, %c0_9, %c0_10] : memref<1x1x8xf32, #tpu.memory_space<vmem>>, vector<1x1x8xf32>
    %7 = vector.shape_cast %6 : vector<1x1x8xf32> to vector<1x8xf32>
    %cst = arith.constant 0.000000e+00 : f32
    %8 = vector.broadcast %cst : f32 to vector<8x32xf32>
    %9 = vector.extract_strided_slice %1 {offsets = [0, 0], sizes = [8, 8], strides = [1, 1]} : vector<8x32xbf16> to vector<8x8xbf16>
    %10 = vector.extract_strided_slice %3 {offsets = [0, 0], sizes = [8, 8], strides = [1, 1]} : vector<8x32xbf16> to vector<8x8xbf16>
    %11 = vector.extract_strided_slice %5 {offsets = [0, 0], sizes = [8, 8], strides = [1, 1]} : vector<8x32xbf16> to vector<8x8xbf16>
    %cst_11 = arith.constant dense<0.000000e+00> : vector<8x8xf32>
    %12 = tpu.matmul %9, %10, %cst_11 {dimension_numbers = #tpu.dot_dimension_numbers<[1], [1], [0], [0], [0, 0, 1, 0], [], []>} : vector<8x8xbf16>, vector<8x8xbf16>, vector<8x8xf32> -> vector<8x8xf32>
    %13 = vector.broadcast %7 : vector<1x8xf32> to vector<8x8xf32>
    %14 = arith.addf %12, %13 : vector<8x8xf32>
    %cst_12 = arith.constant dense<0xFF800000> : vector<8xf32>
    %15 = vector.multi_reduction <maximumf>, %14, %cst_12 [1] : vector<8x8xf32> to vector<8xf32>
    %16 = vector.shape_cast %15 : vector<8xf32> to vector<8x1xf32>
    %17 = vector.broadcast %16 : vector<8x1xf32> to vector<8x8xf32>
    %18 = arith.subf %14, %17 : vector<8x8xf32>
    %19 = math.exp %18 : vector<8x8xf32>
    %cst_13 = arith.constant dense<0.000000e+00> : vector<8xf32>
    %20 = vector.multi_reduction <add>, %19, %cst_13 [1] : vector<8x8xf32> to vector<8xf32>
    %21 = vector.shape_cast %20 : vector<8xf32> to vector<8x1xf32>
    %22 = tpu.reciprocal %21 {approx = true} : vector<8x1xf32> -> vector<8x1xf32>
    %23 = vector.broadcast %22 : vector<8x1xf32> to vector<8x8xf32>
    %24 = arith.mulf %19, %23 : vector<8x8xf32>
    %25 = arith.truncf %24 : vector<8x8xf32> to vector<8x8xbf16>
    %cst_14 = arith.constant dense<0.000000e+00> : vector<8x8xf32>
    %26 = tpu.matmul %25, %11, %cst_14 {dimension_numbers = #tpu.dot_dimension_numbers<[1], [0], [0], [1], [0, 0, 1, 1], [], []>} : vector<8x8xbf16>, vector<8x8xbf16>, vector<8x8xf32> -> vector<8x8xf32>
    %27 = arith.truncf %26 : vector<8x8xf32> to vector<8x8xbf16>
    %c0_15 = arith.constant 0 : index
    %c0_16 = arith.constant 0 : index
    %28 = vector.load %arg7[%c0_15, %c0_16] : memref<32x32xbf16, #tpu.memory_space<vmem>>, vector<8x32xbf16>
    %cst_17 = arith.constant dense<0.000000e+00> : vector<8x32xf32>
    %29 = tpu.matmul %27, %28, %cst_17 {dimension_numbers = #tpu.dot_dimension_numbers<[1], [0], [0], [1], [0, 0, 1, 1], [], []>} : vector<8x8xbf16>, vector<8x32xbf16>, vector<8x32xf32> -> vector<8x32xf32>
    %30 = arith.addf %8, %29 : vector<8x32xf32>
    %31 = vector.extract_strided_slice %1 {offsets = [0, 8], sizes = [8, 8], strides = [1, 1]} : vector<8x32xbf16> to vector<8x8xbf16>
    %32 = vector.extract_strided_slice %3 {offsets = [0, 8], sizes = [8, 8], strides = [1, 1]} : vector<8x32xbf16> to vector<8x8xbf16>
    %33 = vector.extract_strided_slice %5 {offsets = [0, 8], sizes = [8, 8], strides = [1, 1]} : vector<8x32xbf16> to vector<8x8xbf16>
    %cst_18 = arith.constant dense<0.000000e+00> : vector<8x8xf32>
    %34 = tpu.matmul %31, %32, %cst_18 {dimension_numbers = #tpu.dot_dimension_numbers<[1], [1], [0], [0], [0, 0, 1, 0], [], []>} : vector<8x8xbf16>, vector<8x8xbf16>, vector<8x8xf32> -> vector<8x8xf32>
    %35 = vector.broadcast %7 : vector<1x8xf32> to vector<8x8xf32>
    %36 = arith.addf %34, %35 : vector<8x8xf32>
    %cst_19 = arith.constant dense<0xFF800000> : vector<8xf32>
    %37 = vector.multi_reduction <maximumf>, %36, %cst_19 [1] : vector<8x8xf32> to vector<8xf32>
    %38 = vector.shape_cast %37 : vector<8xf32> to vector<8x1xf32>
    %39 = vector.broadcast %38 : vector<8x1xf32> to vector<8x8xf32>
    %40 = arith.subf %36, %39 : vector<8x8xf32>
    %41 = math.exp %40 : vector<8x8xf32>
    %cst_20 = arith.constant dense<0.000000e+00> : vector<8xf32>
    %42 = vector.multi_reduction <add>, %41, %cst_20 [1] : vector<8x8xf32> to vector<8xf32>
    %43 = vector.shape_cast %42 : vector<8xf32> to vector<8x1xf32>
    %44 = tpu.reciprocal %43 {approx = true} : vector<8x1xf32> -> vector<8x1xf32>
    %45 = vector.broadcast %44 : vector<8x1xf32> to vector<8x8xf32>
    %46 = arith.mulf %41, %45 : vector<8x8xf32>
    %47 = arith.truncf %46 : vector<8x8xf32> to vector<8x8xbf16>
    %cst_21 = arith.constant dense<0.000000e+00> : vector<8x8xf32>
    %48 = tpu.matmul %47, %33, %cst_21 {dimension_numbers = #tpu.dot_dimension_numbers<[1], [0], [0], [1], [0, 0, 1, 1], [], []>} : vector<8x8xbf16>, vector<8x8xbf16>, vector<8x8xf32> -> vector<8x8xf32>
    %49 = arith.truncf %48 : vector<8x8xf32> to vector<8x8xbf16>
    %c8 = arith.constant 8 : index
    %c0_22 = arith.constant 0 : index
    %50 = vector.load %arg7[%c8, %c0_22] : memref<32x32xbf16, #tpu.memory_space<vmem>>, vector<8x32xbf16>
    %cst_23 = arith.constant dense<0.000000e+00> : vector<8x32xf32>
    %51 = tpu.matmul %49, %50, %cst_23 {dimension_numbers = #tpu.dot_dimension_numbers<[1], [0], [0], [1], [0, 0, 1, 1], [], []>} : vector<8x8xbf16>, vector<8x32xbf16>, vector<8x32xf32> -> vector<8x32xf32>
    %52 = arith.addf %30, %51 : vector<8x32xf32>
    %53 = vector.extract_strided_slice %1 {offsets = [0, 16], sizes = [8, 8], strides = [1, 1]} : vector<8x32xbf16> to vector<8x8xbf16>
    %54 = vector.extract_strided_slice %3 {offsets = [0, 16], sizes = [8, 8], strides = [1, 1]} : vector<8x32xbf16> to vector<8x8xbf16>
    %55 = vector.extract_strided_slice %5 {offsets = [0, 16], sizes = [8, 8], strides = [1, 1]} : vector<8x32xbf16> to vector<8x8xbf16>
    %cst_24 = arith.constant dense<0.000000e+00> : vector<8x8xf32>
    %56 = tpu.matmul %53, %54, %cst_24 {dimension_numbers = #tpu.dot_dimension_numbers<[1], [1], [0], [0], [0, 0, 1, 0], [], []>} : vector<8x8xbf16>, vector<8x8xbf16>, vector<8x8xf32> -> vector<8x8xf32>
    %57 = vector.broadcast %7 : vector<1x8xf32> to vector<8x8xf32>
    %58 = arith.addf %56, %57 : vector<8x8xf32>
    %cst_25 = arith.constant dense<0xFF800000> : vector<8xf32>
    %59 = vector.multi_reduction <maximumf>, %58, %cst_25 [1] : vector<8x8xf32> to vector<8xf32>
    %60 = vector.shape_cast %59 : vector<8xf32> to vector<8x1xf32>
    %61 = vector.broadcast %60 : vector<8x1xf32> to vector<8x8xf32>
    %62 = arith.subf %58, %61 : vector<8x8xf32>
    %63 = math.exp %62 : vector<8x8xf32>
    %cst_26 = arith.constant dense<0.000000e+00> : vector<8xf32>
    %64 = vector.multi_reduction <add>, %63, %cst_26 [1] : vector<8x8xf32> to vector<8xf32>
    %65 = vector.shape_cast %64 : vector<8xf32> to vector<8x1xf32>
    %66 = tpu.reciprocal %65 {approx = true} : vector<8x1xf32> -> vector<8x1xf32>
    %67 = vector.broadcast %66 : vector<8x1xf32> to vector<8x8xf32>
    %68 = arith.mulf %63, %67 : vector<8x8xf32>
    %69 = arith.truncf %68 : vector<8x8xf32> to vector<8x8xbf16>
    %cst_27 = arith.constant dense<0.000000e+00> : vector<8x8xf32>
    %70 = tpu.matmul %69, %55, %cst_27 {dimension_numbers = #tpu.dot_dimension_numbers<[1], [0], [0], [1], [0, 0, 1, 1], [], []>} : vector<8x8xbf16>, vector<8x8xbf16>, vector<8x8xf32> -> vector<8x8xf32>
    %71 = arith.truncf %70 : vector<8x8xf32> to vector<8x8xbf16>
    %c16 = arith.constant 16 : index
    %c0_28 = arith.constant 0 : index
    %72 = vector.load %arg7[%c16, %c0_28] : memref<32x32xbf16, #tpu.memory_space<vmem>>, vector<8x32xbf16>
    %cst_29 = arith.constant dense<0.000000e+00> : vector<8x32xf32>
    %73 = tpu.matmul %71, %72, %cst_29 {dimension_numbers = #tpu.dot_dimension_numbers<[1], [0], [0], [1], [0, 0, 1, 1], [], []>} : vector<8x8xbf16>, vector<8x32xbf16>, vector<8x32xf32> -> vector<8x32xf32>
    %74 = arith.addf %52, %73 : vector<8x32xf32>
    %75 = vector.extract_strided_slice %1 {offsets = [0, 24], sizes = [8, 8], strides = [1, 1]} : vector<8x32xbf16> to vector<8x8xbf16>
    %76 = vector.extract_strided_slice %3 {offsets = [0, 24], sizes = [8, 8], strides = [1, 1]} : vector<8x32xbf16> to vector<8x8xbf16>
    %77 = vector.extract_strided_slice %5 {offsets = [0, 24], sizes = [8, 8], strides = [1, 1]} : vector<8x32xbf16> to vector<8x8xbf16>
    %cst_30 = arith.constant dense<0.000000e+00> : vector<8x8xf32>
    %78 = tpu.matmul %75, %76, %cst_30 {dimension_numbers = #tpu.dot_dimension_numbers<[1], [1], [0], [0], [0, 0, 1, 0], [], []>} : vector<8x8xbf16>, vector<8x8xbf16>, vector<8x8xf32> -> vector<8x8xf32>
    %79 = vector.broadcast %7 : vector<1x8xf32> to vector<8x8xf32>
    %80 = arith.addf %78, %79 : vector<8x8xf32>
    %cst_31 = arith.constant dense<0xFF800000> : vector<8xf32>
    %81 = vector.multi_reduction <maximumf>, %80, %cst_31 [1] : vector<8x8xf32> to vector<8xf32>
    %82 = vector.shape_cast %81 : vector<8xf32> to vector<8x1xf32>
    %83 = vector.broadcast %82 : vector<8x1xf32> to vector<8x8xf32>
    %84 = arith.subf %80, %83 : vector<8x8xf32>
    %85 = math.exp %84 : vector<8x8xf32>
    %cst_32 = arith.constant dense<0.000000e+00> : vector<8xf32>
    %86 = vector.multi_reduction <add>, %85, %cst_32 [1] : vector<8x8xf32> to vector<8xf32>
    %87 = vector.shape_cast %86 : vector<8xf32> to vector<8x1xf32>
    %88 = tpu.reciprocal %87 {approx = true} : vector<8x1xf32> -> vector<8x1xf32>
    %89 = vector.broadcast %88 : vector<8x1xf32> to vector<8x8xf32>
    %90 = arith.mulf %85, %89 : vector<8x8xf32>
    %91 = arith.truncf %90 : vector<8x8xf32> to vector<8x8xbf16>
    %cst_33 = arith.constant dense<0.000000e+00> : vector<8x8xf32>
    %92 = tpu.matmul %91, %77, %cst_33 {dimension_numbers = #tpu.dot_dimension_numbers<[1], [0], [0], [1], [0, 0, 1, 1], [], []>} : vector<8x8xbf16>, vector<8x8xbf16>, vector<8x8xf32> -> vector<8x8xf32>
    %93 = arith.truncf %92 : vector<8x8xf32> to vector<8x8xbf16>
    %c24 = arith.constant 24 : index
    %c0_34 = arith.constant 0 : index
    %94 = vector.load %arg7[%c24, %c0_34] : memref<32x32xbf16, #tpu.memory_space<vmem>>, vector<8x32xbf16>
    %cst_35 = arith.constant dense<0.000000e+00> : vector<8x32xf32>
    %95 = tpu.matmul %93, %94, %cst_35 {dimension_numbers = #tpu.dot_dimension_numbers<[1], [0], [0], [1], [0, 0, 1, 1], [], []>} : vector<8x8xbf16>, vector<8x32xbf16>, vector<8x32xf32> -> vector<8x32xf32>
    %96 = arith.addf %74, %95 : vector<8x32xf32>
    %c0_36 = arith.constant 0 : index
    %c0_37 = arith.constant 0 : index
    %c0_38 = arith.constant 0 : index
    %97 = vector.load %arg6[%c0_36, %c0_37, %c0_38] : memref<1x8x32xf32, #tpu.memory_space<vmem>>, vector<1x8x32xf32>
    %98 = vector.shape_cast %97 : vector<1x8x32xf32> to vector<8x32xf32>
    %99 = arith.addf %98, %96 : vector<8x32xf32>
    %c0_39 = arith.constant 0 : index
    %c0_40 = arith.constant 0 : index
    %100 = vector.load %arg8[%c0_39, %c0_40] : memref<1x32xf32, #tpu.memory_space<vmem>>, vector<1x32xf32>
    %101 = vector.broadcast %100 : vector<1x32xf32> to vector<8x32xf32>
    %102 = arith.addf %99, %101 : vector<8x32xf32>
    %c0_41 = arith.constant 0 : index
    %c0_42 = arith.constant 0 : index
    %c0_43 = arith.constant 0 : index
    %103 = vector.load %arg9[%c0_41, %c0_42, %c0_43] : memref<1x8x32xf32, #tpu.memory_space<vmem>>, vector<1x8x32xf32>
    %104 = vector.shape_cast %103 : vector<1x8x32xf32> to vector<8x32xf32>
    %105 = vector.shape_cast %102 : vector<8x32xf32> to vector<1x8x32xf32>
    tpu.vector_store %arg9[%c0_41, %c0_42, %c0_43], %105 {strides = array<i32>} : memref<1x8x32xf32, #tpu.memory_space<vmem>>, vector<1x8x32xf32>,
    return
  }
  func.func @transform_0(%arg0: i32, %arg1: i32) -> (i32, i32, i32) {
    %c0_i32 = arith.constant 0 : i32
    %c0_i32_0 = arith.constant 0 : i32
    return %arg0, %arg1, %c0_i32 : i32, i32, i32
  }
  func.func @transform_1(%arg0: i32, %arg1: i32) -> (i32, i32, i32) {
    %c0_i32 = arith.constant 0 : i32
    %c0_i32_0 = arith.constant 0 : i32
    %c0_i32_1 = arith.constant 0 : i32
    return %arg0, %c0_i32, %c0_i32_0 : i32, i32, i32
  }
  func.func @transform_2(%arg0: i32, %arg1: i32) -> (i32, i32, i32) {
    %c0_i32 = arith.constant 0 : i32
    %c0_i32_0 = arith.constant 0 : i32
    %c0_i32_1 = arith.constant 0 : i32
    return %arg0, %c0_i32, %c0_i32_0 : i32, i32, i32
  }
  func.func @transform_3(%arg0: i32, %arg1: i32) -> (i32, i32, i32) {
    %c0_i32 = arith.constant 0 : i32
    %c0_i32_0 = arith.constant 0 : i32
    %c0_i32_1 = arith.constant 0 : i32
    return %arg0, %c0_i32, %c0_i32_0 : i32, i32, i32
  }
  func.func @transform_4(%arg0: i32, %arg1: i32) -> (i32, i32, i32) {
    %c0_i32 = arith.constant 0 : i32
    %c0_i32_0 = arith.constant 0 : i32
    return %arg0, %arg1, %c0_i32 : i32, i32, i32
  }
  func.func @transform_5(%arg0: i32, %arg1: i32) -> (i32, i32) {
    %c0_i32 = arith.constant 0 : i32
    %c0_i32_0 = arith.constant 0 : i32
    %c0_i32_1 = arith.constant 0 : i32
    return %c0_i32, %c0_i32_0 : i32, i32
  }
  func.func @transform_6(%arg0: i32, %arg1: i32) -> (i32, i32) {
    %c0_i32 = arith.constant 0 : i32
    %c0_i32_0 = arith.constant 0 : i32
    %c0_i32_1 = arith.constant 0 : i32
    return %c0_i32, %c0_i32_0 : i32, i32
  }
  func.func @transform_7(%arg0: i32, %arg1: i32) -> (i32, i32, i32) {
    %c0_i32 = arith.constant 0 : i32
    %c0_i32_0 = arith.constant 0 : i32
    return %arg0, %arg1, %c0_i32 : i32, i32, i32
  }
}

module attributes {stable_mosaic.version = 11 : i64} {
  func.func @_decoder_kernel(%arg0: i32, %arg1: memref<16x32xf32, #tpu.memory_space<vmem>>, %arg2: memref<32x16xbf16, #tpu.memory_space<vmem>>, %arg3: memref<1x16xf32, #tpu.memory_space<vmem>>, %arg4: memref<16x8xbf16, #tpu.memory_space<vmem>>, %arg5: memref<1x8xf32, #tpu.memory_space<vmem>>, %arg6: memref<8x128xbf16, #tpu.memory_space<vmem>>, %arg7: memref<1x128xf32, #tpu.memory_space<vmem>>, %arg8: memref<16x128xf32, #tpu.memory_space<vmem>>) attributes {dimension_semantics = [#tpu.dimension_semantics<parallel>], iteration_bounds = array<i64: 1>, scalar_prefetch = 0 : i64, scratch_operands = 0 : i64, tpu.core_type = #tpu.core_type<tc>, window_params = [{transform_indices = @transform_0, window_bounds = array<i64: 16, 32>}, {pipeline_mode = #tpu.pipeline_mode<synchronous>, transform_indices = @transform_1, window_bounds = array<i64: 32, 16>}, {pipeline_mode = #tpu.pipeline_mode<synchronous>, transform_indices = @transform_2, window_bounds = array<i64: 1, 16>}, {pipeline_mode = #tpu.pipeline_mode<synchronous>, transform_indices = @transform_3, window_bounds = array<i64: 16, 8>}, {pipeline_mode = #tpu.pipeline_mode<synchronous>, transform_indices = @transform_4, window_bounds = array<i64: 1, 8>}, {pipeline_mode = #tpu.pipeline_mode<synchronous>, transform_indices = @transform_5, window_bounds = array<i64: 8, 128>}, {pipeline_mode = #tpu.pipeline_mode<synchronous>, transform_indices = @transform_6, window_bounds = array<i64: 1, 128>}, {transform_indices = @transform_7, window_bounds = array<i64: 16, 128>}]} {
    %c0 = arith.constant 0 : index
    %c0_0 = arith.constant 0 : index
    %0 = vector.load %arg1[%c0, %c0_0] : memref<16x32xf32, #tpu.memory_space<vmem>>, vector<16x32xf32>
    %1 = arith.truncf %0 : vector<16x32xf32> to vector<16x32xbf16>
    %c0_1 = arith.constant 0 : index
    %c0_2 = arith.constant 0 : index
    %2 = vector.load %arg2[%c0_1, %c0_2] : memref<32x16xbf16, #tpu.memory_space<vmem>>, vector<32x16xbf16>
    %cst = arith.constant dense<0.000000e+00> : vector<16x16xf32>
    %3 = tpu.matmul %1, %2, %cst {dimension_numbers = #tpu.dot_dimension_numbers<[1], [0], [0], [1], [0, 0, 1, 1], [], []>} : vector<16x32xbf16>, vector<32x16xbf16>, vector<16x16xf32> -> vector<16x16xf32>
    %c0_3 = arith.constant 0 : index
    %c0_4 = arith.constant 0 : index
    %4 = vector.load %arg3[%c0_3, %c0_4] : memref<1x16xf32, #tpu.memory_space<vmem>>, vector<1x16xf32>
    %5 = vector.broadcast %4 : vector<1x16xf32> to vector<16x16xf32>
    %6 = arith.addf %3, %5 : vector<16x16xf32>
    %7 = arith.truncf %6 : vector<16x16xf32> to vector<16x16xbf16>
    %c0_5 = arith.constant 0 : index
    %c0_6 = arith.constant 0 : index
    %8 = vector.load %arg4[%c0_5, %c0_6] : memref<16x8xbf16, #tpu.memory_space<vmem>>, vector<16x8xbf16>
    %cst_7 = arith.constant dense<0.000000e+00> : vector<16x8xf32>
    %9 = tpu.matmul %7, %8, %cst_7 {dimension_numbers = #tpu.dot_dimension_numbers<[1], [0], [0], [1], [0, 0, 1, 1], [], []>} : vector<16x16xbf16>, vector<16x8xbf16>, vector<16x8xf32> -> vector<16x8xf32>
    %c0_8 = arith.constant 0 : index
    %c0_9 = arith.constant 0 : index
    %10 = vector.load %arg5[%c0_8, %c0_9] : memref<1x8xf32, #tpu.memory_space<vmem>>, vector<1x8xf32>
    %11 = vector.broadcast %10 : vector<1x8xf32> to vector<16x8xf32>
    %12 = arith.addf %9, %11 : vector<16x8xf32>
    %13 = arith.truncf %12 : vector<16x8xf32> to vector<16x8xbf16>
    %c0_10 = arith.constant 0 : index
    %c0_11 = arith.constant 0 : index
    %14 = vector.load %arg6[%c0_10, %c0_11] : memref<8x128xbf16, #tpu.memory_space<vmem>>, vector<8x128xbf16>
    %cst_12 = arith.constant dense<0.000000e+00> : vector<16x128xf32>
    %15 = tpu.matmul %13, %14, %cst_12 {dimension_numbers = #tpu.dot_dimension_numbers<[1], [0], [0], [1], [0, 0, 1, 1], [], []>} : vector<16x8xbf16>, vector<8x128xbf16>, vector<16x128xf32> -> vector<16x128xf32>
    %c0_13 = arith.constant 0 : index
    %c0_14 = arith.constant 0 : index
    %16 = vector.load %arg7[%c0_13, %c0_14] : memref<1x128xf32, #tpu.memory_space<vmem>>, vector<1x128xf32>
    %17 = vector.broadcast %16 : vector<1x128xf32> to vector<16x128xf32>
    %18 = arith.addf %15, %17 : vector<16x128xf32>
    %c0_15 = arith.constant 0 : index
    %c0_16 = arith.constant 0 : index
    %19 = vector.load %arg8[%c0_15, %c0_16] : memref<16x128xf32, #tpu.memory_space<vmem>>, vector<16x128xf32>
    tpu.vector_store %arg8[%c0_15, %c0_16], %18 {strides = array<i32>} : memref<16x128xf32, #tpu.memory_space<vmem>>, vector<16x128xf32>,
    return
  }
  func.func @transform_0(%arg0: i32) -> (i32, i32) {
    %c0_i32 = arith.constant 0 : i32
    %c0_i32_0 = arith.constant 0 : i32
    return %arg0, %c0_i32 : i32, i32
  }
  func.func @transform_1(%arg0: i32) -> (i32, i32) {
    %c0_i32 = arith.constant 0 : i32
    %c0_i32_0 = arith.constant 0 : i32
    %c0_i32_1 = arith.constant 0 : i32
    return %c0_i32, %c0_i32_0 : i32, i32
  }
  func.func @transform_2(%arg0: i32) -> (i32, i32) {
    %c0_i32 = arith.constant 0 : i32
    %c0_i32_0 = arith.constant 0 : i32
    %c0_i32_1 = arith.constant 0 : i32
    return %c0_i32, %c0_i32_0 : i32, i32
  }
  func.func @transform_3(%arg0: i32) -> (i32, i32) {
    %c0_i32 = arith.constant 0 : i32
    %c0_i32_0 = arith.constant 0 : i32
    %c0_i32_1 = arith.constant 0 : i32
    return %c0_i32, %c0_i32_0 : i32, i32
  }
  func.func @transform_4(%arg0: i32) -> (i32, i32) {
    %c0_i32 = arith.constant 0 : i32
    %c0_i32_0 = arith.constant 0 : i32
    %c0_i32_1 = arith.constant 0 : i32
    return %c0_i32, %c0_i32_0 : i32, i32
  }
  func.func @transform_5(%arg0: i32) -> (i32, i32) {
    %c0_i32 = arith.constant 0 : i32
    %c0_i32_0 = arith.constant 0 : i32
    %c0_i32_1 = arith.constant 0 : i32
    return %c0_i32, %c0_i32_0 : i32, i32
  }
  func.func @transform_6(%arg0: i32) -> (i32, i32) {
    %c0_i32 = arith.constant 0 : i32
    %c0_i32_0 = arith.constant 0 : i32
    %c0_i32_1 = arith.constant 0 : i32
    return %c0_i32, %c0_i32_0 : i32, i32
  }
  func.func @transform_7(%arg0: i32) -> (i32, i32) {
    %c0_i32 = arith.constant 0 : i32
    %c0_i32_0 = arith.constant 0 : i32
    return %arg0, %c0_i32 : i32, i32
  }
}

</mosaic_0001>

<bundles_post_ra>
// kernel: model_head_forward.8
= control target key start
LH: loop header
LB: loop body
LE: loop exit
PB: predicated region body
PF: predicated region fallthrough
CT: control target
= control target key end

     0   :  { %vm19_vm0 = vcmask 261120   ;;  %v119_v0 = vmov 0.0   ;;  %vm120_vm1 = vmmov 0   ;;  %vm35_vm2 = vcmask 130048   ;;  %s165_s1 = inlined_call_operand.vmem [shape: bf16[16,32], index: 1, kind: input, shape index: {}]   ;;  %s166_s0 = inlined_call_operand.vmem [shape: f32[16,16], index: 0, kind: input, shape index: {}]   ;;  %s167_s2 = inlined_call_operand.vmem [shape: f32[1,32], index: 2, kind: input, shape index: {}]   ;;  %s168_s3 = inlined_call_operand.vmem [shape: f32[16,32], index: 3, kind: output, shape index: {}]  }
   0x1   :  { %20 = vst.msk [vmem:[#allocation2] sm:$0xff] %vm19_vm0, %v119_v0  ;;  %21 = vst.msk [vmem:[#allocation2 + $0x8] sm:$0xff] %vm19_vm0, %v119_v0  ;;  %110 = vmatprep.subr.bf16.mxu0 %v119_v0  ;;  %v118_v1 = vld [vmem:[%s165_s1] sm:$0xff]   ;;  %112 = vmatprep.mubr.msk.bf16.mxu0 %vm120_vm1, %v119_v0  ;;  %v25_v3 = vld [vmem:[%s166_s0 + $0x8] sm:$0xff] }
   0x2   :  { %v24_v2 = vld [vmem:[%s166_s0] sm:$0xff]  ;;  %111 = vmatpush3.bf16.msra.mxu0 %v118_v1 }
   0x3   :  { %v26_v4 = vpack.c.bf16 %v25_v3, %v24_v2  ;;  %v107_v13 = vld [vmem:[%s167_s2] ss:$0 sm:$0xff] }
   0x5   :  { %113 = vmatmul.mubr.msk.bf16.vlgmr.msra.gmra.mrb[0].mxu0 %vm35_vm2, %v26_v4 }
   0x8   :  { %v22_v5 = vld [vmem:[#allocation2] sm:$0xff]  ;;  %v23_v7 = vld [vmem:[#allocation2 + $0x8] sm:$0xff] }
  0xd8   :  { %v73_v6 = vpop.f32.mrb[0].mxu0 }
  0xd9   :  { %v80_v8 = vadd.f32 %v73_v6, %v22_v5  ;;  %v114_v9 = vpop.f32.mrb[1].mxu0 }
  0xda   :  { %v76_v10 = vpop.f32.mrb[2].mxu0 }
  0xdb   :  { %83 = vst.msk [vmem:[#allocation2] sm:$0xff] %vm19_vm0, %v80_v8  ;;  %v81_v11 = vadd.f32 %v76_v10, %v23_v7  ;;  %v115_v12 = vpop.f32.mrb[3].mxu0 }
  0xdd   :  { %84 = vst.msk [vmem:[#allocation2 + $0x8] sm:$0xff] %vm19_vm0, %v81_v11 }
  0xe2   :  { %v88_v14 = vld [vmem:[#allocation2] sm:$0xff] }
  0xe3   :  { %v97_v15 = vadd.f32 %v107_v13, %v88_v14 }
  0xe4   :  { %v89_v16 = vld [vmem:[#allocation2 + $0x8] sm:$0xff] }
  0xe5   :  { %99 = vst.msk [vmem:[%s168_s3] sm:$0xff] %vm19_vm0, %v97_v15  ;;  %v98_v17 = vadd.f32 %v107_v13, %v89_v16 }
  0xe7   :  { %100 = vst.msk [vmem:[%s168_s3 + $0x8] sm:$0xff] %vm19_vm0, %v98_v17 }

// kernel: model_head_forward.9
= control target key start
LH: loop header
LB: loop body
LE: loop exit
PB: predicated region body
PF: predicated region fallthrough
CT: control target
= control target key end

     0   :  { %vm28_vm0 = vcmask 261120   ;;  %v210_v15 = vmov 0.0   ;;  %vm211_vm1 = vmmov 0   ;;  %vm148_vm2 = vcmask 257024   ;;  %s212_s13 = smov 64   ;;  %s213_s14 = smov 96   ;;  %s304_s0 = inlined_call_operand.vmem [shape: f32[16,32], index: 0, kind: input, shape index: {}]   ;;  %s305_s3 = inlined_call_operand.vmem [shape: bf16[32,96], index: 3, kind: input, shape index: {}]   ;;  %s306_s1 = inlined_call_operand.vmem [shape: f32[1,32], index: 1, kind: input, shape index: {}]   ;;  %s307_s2 = inlined_call_operand.vmem [shape: f32[1,32], index: 2, kind: input, shape index: {}]   ;;  %s308_s4 = inlined_call_operand.vmem [shape: f32[1,96], index: 4, kind: input, shape index: {}]   ;;  %s309_s5 = inlined_call_operand.vmem [shape: bf16[16,32], index: 5, kind: output, shape index: {0}]   ;;  %s310_s7 = inlined_call_operand.vmem [shape: bf16[16,32], index: 7, kind: output, shape index: {2}]   ;;  %s311_s6 = inlined_call_operand.vmem [shape: bf16[16,32], index: 6, kind: output, shape index: {1}]  }
   0x1   :  { %v24_v0 = vld [vmem:[%s304_s0] sm:$0xff]  ;;  %v25_v1 = vld [vmem:[%s304_s0 + $0x8] sm:$0xff]  ;;  %192 = vmatprep.subr.bf16.mxu0 %v210_v15  ;;  %196 = vmatprep.mubr.msk.bf16.mxu0 %vm211_vm1, %v210_v15 }
   0x2   :  { %v29_v2 = vsel %vm28_vm0, %v24_v0, 0.0  ;;  %v32_v3 = vsel %vm28_vm0, %v25_v1, 0.0  ;;  %v204_v14 = vld [vmem:[%s305_s3] sm:$0xff]   ;;  %v205_v16 = vld [vmem:[%s305_s3 + $0x8] sm:$0xff]  }
   0x3   :  { %30 = vadd.xlane.f32.xlu0 %v29_v2  ;;  %193 = vmatpush3.bf16.msra.mxu0 %v204_v14  ;;  %v179_v25 = vld [vmem:[%s306_s1] ss:$0 sm:$0xff] }
   0x4   :  { %194 = vmatprep.subr.bf16.mxu0 %v210_v15  ;;  %v180_v29 = vld [vmem:[%s307_s2] ss:$0 sm:$0xff] }
   0x5   :  { %v181_v34 = vld [vmem:[%s308_s4] ss:$0 sm:$0xff] }
   0x7   :  { %33 = vadd.xlane.f32.xlu0 %v32_v3  ;;  %195 = vmatpush3.bf16.msra.mxu0 %v205_v16 }
  0x90   :  { %v31_v4 = vpop.xlane.xlu0 %30 }
  0x91   :  { %v36_v5 = vmul.f32 0.03125, %v31_v4 }
  0x93   :  { %v38_v6 = vsub.f32 %v24_v0, %v36_v5 }
  0x94   :  { %v34_v7 = vpop.xlane.xlu0 %33 }
  0x95   :  { %v37_v8 = vmul.f32 0.03125, %v34_v7  ;;  %v40_v9 = vmul.f32 %v38_v6, %v38_v6 }
  0x97   :  { %v39_v10 = vsub.f32 %v25_v1, %v37_v8  ;;  %v42_v11 = vsel %vm28_vm0, %v40_v9, 0.0 }
  0x98   :  { %43 = vadd.xlane.f32.xlu1 %v42_v11 }
  0x99   :  { %v41_v12 = vmul.f32 %v39_v10, %v39_v10 }
  0x9b   :  { %v45_v13 = vsel %vm28_vm0, %v41_v12, 0.0 }
  0x9c   :  { %46 = vadd.xlane.f32.xlu1 %v45_v13 }
 0x125   :  { %v44_v17 = vpop.xlane.xlu1 %43 }
 0x126   :  { %v48_v18 = vmul.f32 0.03125, %v44_v17 }
 0x128   :  { %v50_v19 = vadd.f32 1e-05, %v48_v18 }
 0x129   :  { %v47_v20 = vpop.xlane.xlu1 %46 }
 0x12a   :  { %206 = vrsqrt.f32 %v50_v19  ;;  %v49_v21 = vmul.f32 0.03125, %v47_v20 }
 0x12c   :  { %v51_v22 = vadd.f32 1e-05, %v49_v21 }
 0x12e   :  { %208 = vrsqrt.f32 %v51_v22 }
 0x134   :  { %v207_v23 = vpop.eup %206 }
 0x135   :  { %v54_v24 = vmul.f32 %v207_v23, %v38_v6 }
 0x137   :  { %v62_v28 = vmul.f32 %v179_v25, %v54_v24 }
 0x138   :  { %v209_v26 = vpop.eup %208 }
 0x139   :  { %v55_v27 = vmul.f32 %v209_v26, %v39_v10  ;;  %v70_v31 = vadd.f32 %v180_v29, %v62_v28 }
 0x13b   :  { %v63_v30 = vmul.f32 %v179_v25, %v55_v27 }
 0x13d   :  { %v71_v32 = vadd.f32 %v180_v29, %v63_v30 }
 0x13f   :  { %v72_v33 = vpack.c.bf16 %v71_v32, %v70_v31 }
 0x141   :  { %197 = vmatmul.mubr.msk.bf16.vlgmr.msra.gmra.mrb[0].mxu0 %vm28_vm0, %v72_v33 }
 0x214   :  { %v133_v35 = vpop.f32.mrb[0].mxu0 }
 0x215   :  { %v134_v36 = vadd.f32 %v181_v34, %v133_v35  ;;  %v198_v37 = vpop.f32.mrb[1].mxu0 }
 0x216   :  { %v136_v38 = vpop.f32.mrb[2].mxu0 }
 0x217   :  { %v187_v39 = vpack.c.bf16 %v134_v36, %v134_v36  ;;  %v137_v40 = vadd.f32 %v181_v34, %v136_v38  ;;  %v199_v41 = vpop.f32.mrb[3].mxu0 }
 0x219   :  { %149 = vst.msk [vmem:[%s309_s5] sm:$0xf] %vm148_vm2, %v187_v39  ;;  %v188_v42 = vpack.c.bf16 %v137_v40, %v137_v40  ;;  %159 = vrot.lane.b32.xlu1 %v187_v39, %s212_s13  ;;  %151 = vrot.lane.b32.xlu0 %v187_v39, %s213_s14 }
 0x21b   :  { %150 = vst.msk [vmem:[%s309_s5 + $0x4] sm:$0xf] %vm148_vm2, %v188_v42 }
 0x21d   :  { %153 = vrot.lane.b32.xlu1 %v188_v42, %s213_s14 }
 0x221   :  { %161 = vrot.lane.b32.xlu1 %v188_v42, %s212_s13 }
 0x28b   :  { %v160_v43 = vpop.permute.xlu1 %159  ;;  %v152_v44 = vpop.permute.xlu0 %151 }
 0x28c   :  { %165 = vst.msk [vmem:[%s310_s7] sm:$0xf] %vm148_vm2, %v160_v43  ;;  %157 = vst.msk [vmem:[%s311_s6] sm:$0xf] %vm148_vm2, %v152_v44 }
 0x28f   :  { %v154_v45 = vpop.permute.xlu1 %153 }
 0x290   :  { %158 = vst.msk [vmem:[%s311_s6 + $0x4] sm:$0xf] %vm148_vm2, %v154_v45 }
 0x293   :  { %v162_v46 = vpop.permute.xlu1 %161 }
 0x294   :  { %166 = vst.msk [vmem:[%s310_s7 + $0x4] sm:$0xf] %vm148_vm2, %v162_v46 }

// kernel: model_head_forward.11
= control target key start
LH: loop header
LB: loop body
LE: loop exit
PB: predicated region body
PF: predicated region fallthrough
CT: control target
= control target key end

     0   :  { %vm35_vm0 = vcmask 261120   ;;  %v331_v15 = vmov 0.0   ;;  %vm332_vm1 = vmmov 0   ;;  %s432_s0 = inlined_call_operand.vmem [shape: f32[16,32], index: 0, kind: input, shape index: {}]   ;;  %s433_s3 = inlined_call_operand.vmem [shape: bf16[32,32], index: 3, kind: input, shape index: {}]   ;;  %s434_s1 = inlined_call_operand.vmem [shape: f32[1,32], index: 1, kind: input, shape index: {}]   ;;  %s435_s2 = inlined_call_operand.vmem [shape: f32[1,32], index: 2, kind: input, shape index: {}]   ;;  %s436_s5 = inlined_call_operand.vmem [shape: bf16[32,32], index: 5, kind: input, shape index: {}]   ;;  %s437_s4 = inlined_call_operand.vmem [shape: f32[1,32], index: 4, kind: input, shape index: {}]   ;;  %s438_s6 = inlined_call_operand.vmem [shape: f32[1,32], index: 6, kind: input, shape index: {}]   ;;  %s439_s7 = inlined_call_operand.vmem [shape: f32[16,32], index: 7, kind: output, shape index: {}]  }
   0x1   :  { %v376_v0 = vld [vmem:[%s432_s0] sm:$0xff]  ;;  %v381_v1 = vld [vmem:[%s432_s0 + $0x8] sm:$0xff]  ;;  %293 = vmatprep.subr.bf16.mxu0 %v331_v15  ;;  %81 = vst.msk [vmem:[#allocation3] sm:$0xff] %vm35_vm0, %v331_v15  ;;  %82 = vst.msk [vmem:[#allocation3 + $0x8] sm:$0xff] %vm35_vm0, %v331_v15  ;;  %301 = vmatprep.subr.bf16.mxu1 %v331_v15 }
   0x2   :  { %v36_v2 = vsel %vm35_vm0, %v376_v0, 0.0  ;;  %v39_v3 = vsel %vm35_vm0, %v381_v1, 0.0  ;;  %v311_v14 = vld [vmem:[%s433_s3] sm:$0xff]   ;;  %v312_v16 = vld [vmem:[%s433_s3 + $0x8] sm:$0xff]   ;;  %297 = vmatprep.mubr.msk.bf16.mxu0 %vm332_vm1, %v331_v15  ;;  %305 = vmatprep.mubr.msk.bf16.mxu1 %vm332_vm1, %v331_v15 }
   0x3   :  { %37 = vadd.xlane.f32.xlu0 %v36_v2  ;;  %294 = vmatpush3.bf16.msra.mxu0 %v311_v14  ;;  %v277_v25 = vld [vmem:[%s434_s1] ss:$0 sm:$0xff]  ;;  %v314_v36 = vld [vmem:[%s436_s5 + $0x8] sm:$0xff]  }
   0x4   :  { %295 = vmatprep.subr.bf16.mxu0 %v331_v15  ;;  %v278_v29 = vld [vmem:[%s435_s2] ss:$0 sm:$0xff] }
   0x5   :  { %v313_v35 = vld [vmem:[%s436_s5] sm:$0xff]  }
   0x6   :  { %302 = vmatpush3.bf16.msra.mxu1 %v313_v35  ;;  %v279_v37 = vld [vmem:[%s437_s4] ss:$0 sm:$0xff] }
   0x7   :  { %40 = vadd.xlane.f32.xlu0 %v39_v3  ;;  %296 = vmatpush3.bf16.msra.mxu0 %v312_v16 }
   0x8   :  { %303 = vmatprep.subr.bf16.mxu1 %v331_v15  ;;  %v186_v15 = vld [vmem:[#allocation3] sm:$0xff] }
   0xa   :  { %304 = vmatpush3.bf16.msra.mxu1 %v314_v36 }
  0x90   :  { %v38_v4 = vpop.xlane.xlu0 %37 }
  0x91   :  { %v43_v5 = vmul.f32 0.03125, %v38_v4 }
  0x93   :  { %v45_v6 = vsub.f32 %v376_v0, %v43_v5 }
  0x94   :  { %v41_v7 = vpop.xlane.xlu0 %40 }
  0x95   :  { %v44_v8 = vmul.f32 0.03125, %v41_v7  ;;  %v47_v9 = vmul.f32 %v45_v6, %v45_v6 }
  0x97   :  { %v46_v10 = vsub.f32 %v381_v1, %v44_v8  ;;  %v49_v11 = vsel %vm35_vm0, %v47_v9, 0.0 }
  0x98   :  { %50 = vadd.xlane.f32.xlu1 %v49_v11 }
  0x99   :  { %v48_v12 = vmul.f32 %v46_v10, %v46_v10 }
  0x9b   :  { %v52_v13 = vsel %vm35_vm0, %v48_v12, 0.0 }
  0x9c   :  { %53 = vadd.xlane.f32.xlu1 %v52_v13 }
 0x125   :  { %v51_v17 = vpop.xlane.xlu1 %50 }
 0x126   :  { %v55_v18 = vmul.f32 0.03125, %v51_v17  ;;  %v187_v17 = vld [vmem:[#allocation3 + $0x8] sm:$0xff] }
 0x128   :  { %v57_v19 = vadd.f32 1e-05, %v55_v18 }
 0x129   :  { %v54_v20 = vpop.xlane.xlu1 %53 }
 0x12a   :  { %315 = vrsqrt.f32 %v57_v19  ;;  %v56_v21 = vmul.f32 0.03125, %v54_v20 }
 0x12c   :  { %v58_v22 = vadd.f32 1e-05, %v56_v21 }
 0x12e   :  { %317 = vrsqrt.f32 %v58_v22 }
 0x134   :  { %v316_v23 = vpop.eup %315 }
 0x135   :  { %v61_v24 = vmul.f32 %v316_v23, %v45_v6 }
 0x137   :  { %v69_v27 = vmul.f32 %v277_v25, %v61_v24  ;;  %v286_v24 = vld [vmem:[%s438_s6] ss:$0 sm:$0xff] }
 0x138   :  { %v318_v26 = vpop.eup %317 }
 0x139   :  { %v62_v28 = vmul.f32 %v318_v26, %v46_v10  ;;  %v77_v31 = vadd.f32 %v278_v29, %v69_v27 }
 0x13b   :  { %v70_v30 = vmul.f32 %v277_v25, %v62_v28 }
 0x13d   :  { %v78_v32 = vadd.f32 %v278_v29, %v70_v30 }
 0x13f   :  { %v79_v33 = vpack.c.bf16 %v78_v32, %v77_v31 }
 0x141   :  { %80 = vst.msk [vmem:[#allocation2] sm:$0xff] %vm35_vm0, %v79_v33 }
 0x148   :  { %v83_v34 = vld [vmem:[#allocation2] sm:$0xff] }
 0x149   :  { %298 = vmatmul.mubr.msk.bf16.vlgmr.msra.gmra.mrb[0].mxu0 %vm35_vm0, %v83_v34 }
 0x21c   :  { %v145_v38 = vpop.f32.mrb[0].mxu0 }
 0x21d   :  { %v146_v39 = vadd.f32 %v279_v37, %v145_v38  ;;  %v299_v40 = vpop.f32.mrb[1].mxu0 }
 0x21e   :  { %v148_v41 = vpop.f32.mrb[2].mxu0 }
 0x21f   :  { %v154_v42 = vand.u32 2147483647, %v146_v39  ;;  %v149_v43 = vadd.f32 %v279_v37, %v148_v41  ;;  %v300_v44 = vpop.f32.mrb[3].mxu0  ;;  %v152_v2 = vmax.f32 %v146_v39, 0.0 }
 0x221   :  { %v156_v45 = vsub.f32 0.0, %v154_v42  ;;  %v155_v46 = vand.u32 2147483647, %v149_v43  ;;  %v153_v7 = vmax.f32 %v149_v43, 0.0 }
 0x223   :  { %v158_v47 = vmul.f32 1.442695, %v156_v45  ;;  %v157_v48 = vsub.f32 0.0, %v155_v46 }
 0x225   :  { %319 = vpow2.f32 %v158_v47  ;;  %v160_v49 = vmul.f32 1.442695, %v157_v48 }
 0x227   :  { %321 = vpow2.f32 %v160_v49 }
 0x22f   :  { %v320_v50 = vpop.eup %319 }
 0x230   :  { %v162_v51 = vadd.f32 1.0, %v320_v50  ;;  %v165_v54 = vmul.f32 -0.5, %v320_v50  ;;  %v168_v57 = vand.u32 2147483647, %v320_v50 }
 0x231   :  { %v322_v52 = vpop.eup %321 }
 0x232   :  { %323 = vlog2.f32 %v162_v51  ;;  %v171_v53 = vadd.f32 1.0, %v322_v52  ;;  %v174_v55 = vmul.f32 -0.5, %v322_v52  ;;  %v166_v56 = vadd.f32 1.0, %v165_v54 }
 0x233   :  { %v177_v60 = vand.u32 2147483647, %v322_v52  ;;  %vm169_vm2 = vcmp.lt.f32.partialorder %v168_v57, 0.0004427343 }
 0x234   :  { %325 = vlog2.f32 %v171_v53  ;;  %v175_v58 = vadd.f32 1.0, %v174_v55  ;;  %v167_v62 = vmul.f32 %v320_v50, %v166_v56 }
 0x235   :  { %vm178_vm3 = vcmp.lt.f32.partialorder %v177_v60, 0.0004427343 }
 0x236   :  { %v176_v5 = vmul.f32 %v322_v52, %v175_v58 }
 0x23c   :  { %v324_v59 = vpop.eup %323 }
 0x23d   :  { %v164_v61 = vmul.f32 0.6931472, %v324_v59 }
 0x23e   :  { %v326_v63 = vpop.eup %325 }
 0x23f   :  { %v170_v3 = vsel %vm169_vm2, %v167_v62, %v164_v61  ;;  %v173_v4 = vmul.f32 0.6931472, %v326_v63 }
 0x240   :  { %v180_v6 = vadd.f32 %v170_v3, %v152_v2 }
 0x241   :  { %v179_v8 = vsel %vm178_vm3, %v176_v5, %v173_v4 }
 0x242   :  { %327 = vtanh.f32 %v180_v6  ;;  %v181_v9 = vadd.f32 %v179_v8, %v153_v7 }
 0x244   :  { %329 = vtanh.f32 %v181_v9 }
 0x24c   :  { %v328_v10 = vpop.eup %327 }
 0x24d   :  { %v184_v12 = vmul.f32 %v328_v10, %v146_v39 }
 0x24e   :  { %v330_v11 = vpop.eup %329 }
 0x24f   :  { %v185_v13 = vmul.f32 %v330_v11, %v149_v43 }
 0x251   :  { %v188_v14 = vpack.c.bf16 %v185_v13, %v184_v12 }
 0x253   :  { %306 = vmatmul.mubr.msk.bf16.vlgmr.msra.gmra.mrb[0].mxu1 %vm35_vm0, %v188_v14 }
 0x326   :  { %v242_v16 = vpop.f32.mrb[0].mxu1 }
 0x327   :  { %v249_v18 = vadd.f32 %v242_v16, %v186_v15  ;;  %v307_v19 = vpop.f32.mrb[1].mxu1 }
 0x328   :  { %v245_v20 = vpop.f32.mrb[2].mxu1 }
 0x329   :  { %251 = vst.msk [vmem:[#allocation3] sm:$0xff] %vm35_vm0, %v249_v18  ;;  %v250_v21 = vadd.f32 %v245_v20, %v187_v17  ;;  %v308_v22 = vpop.f32.mrb[3].mxu1 }
 0x32b   :  { %252 = vst.msk [vmem:[#allocation3 + $0x8] sm:$0xff] %vm35_vm0, %v250_v21 }
 0x330   :  { %v258_v23 = vld [vmem:[#allocation3] sm:$0xff] }
 0x331   :  { %v260_v25 = vadd.f32 %v258_v23, %v376_v0 }
 0x332   :  { %v259_v26 = vld [vmem:[#allocation3 + $0x8] sm:$0xff] }
 0x333   :  { %v269_v27 = vadd.f32 %v286_v24, %v260_v25  ;;  %v261_v28 = vadd.f32 %v259_v26, %v381_v1 }
 0x335   :  { %271 = vst.msk [vmem:[%s439_s7] sm:$0xff] %vm35_vm0, %v269_v27  ;;  %v270_v29 = vadd.f32 %v286_v24, %v261_v28 }
 0x337   :  { %272 = vst.msk [vmem:[%s439_s7 + $0x8] sm:$0xff] %vm35_vm0, %v270_v29 }

// kernel: model_head_forward.10
= control target key start
LH: loop header
LB: loop body
LE: loop exit
PB: predicated region body
PF: predicated region fallthrough
CT: control target
= control target key end

     0   :  { %s1407_s24 = smov 0   ;;  %s1409_s25 = smov 0   ;;  %s1575_s0 = inlined_call_operand.vmem [shape: bf16[2,8,32], index: 0, kind: input, shape index: {}]   ;;  %s1576_s1 = inlined_call_operand.vmem [shape: bf16[2,8,32], index: 1, kind: input, shape index: {}]   ;;  %s1577_s2 = inlined_call_operand.vmem [shape: bf16[2,8,32], index: 2, kind: input, shape index: {}]   ;;  %s1578_s3 = inlined_call_operand.vmem [shape: f32[2,1,8], index: 3, kind: input, shape index: {}]   ;;  %s1579_s4 = inlined_call_operand.vmem [shape: f32[2,8,32], index: 4, kind: input, shape index: {}]   ;;  %s1580_s5 = inlined_call_operand.vmem [shape: bf16[32,32], index: 5, kind: input, shape index: {}]   ;;  %s1581_s6 = inlined_call_operand.vmem [shape: f32[1,32], index: 6, kind: input, shape index: {}]   ;;  %s1582_s7 = inlined_call_operand.vmem [shape: f32[2,8,32], index: 7, kind: output, shape index: {}]  }
   0x1   :  { %s1411_s26 = smov 0  }
   0x2 LB: > { %s29_s27 = sadd.s32 1, %s1356_s25  ;;  %p1169_p0 = scmp.ge.s32.totalorder %s1360_s26, 1  ;;  %s1360_s26 = sphi %s1411_s26, %s17_s26   ;;  %s1356_s25 = sphi %s1409_s25, %s1584_s25   ;;  %s1352_s24 = sphi %s1407_s24, %s1583_s24  }
   0x3   : > { %p31_p1 = scmp.ge.s32.totalorder %s29_s27, 2  ;;  %p295_p2 = scmp.lt.s32.totalorder %s1360_s26, 3 }
   0x5   : > { %s1586_s27 = smov (%p31_p1, %s29_s27), 0  ;;  %p296_p3 = pnand %p1169_p0, %p295_p2 }
   0x6   : > { %p349_p4 = scmp.lt.s32.totalorder (!%p296_p3), %s1352_s24, 1  ;;  %v1362_v0 = vmov (!%p296_p3), 0.0   ;;  %vm1363_vm0 = vmmov (!%p296_p3), 0   ;;  %vm392_vm1 = vcmask (!%p296_p3), 64512   ;;  %s1364_s15 = smov (!%p296_p3), 120   ;;  %vm454_vm2 = vcmask (!%p296_p3), 1043456  }
   0x7   : > { %299 = sbr.rel (%p296_p3) target bundleno = 2817 (0xb01), region = 48  ;;  %1218 = vmatprep.subr.bf16.mxu0 (!%p296_p3), %v1362_v0  ;;  %1220 = vmatprep.mubr.msk.bf16.mxu0 (!%p296_p3), %vm1363_vm0, %v1362_v0  ;;  %v620_v45 = vld [vmem:[%s1580_s5 + $0x4] sm:$0xf] (!%p296_p3)  ;;  %s1365_s21 = smov (!%p296_p3), 112   ;;  %v499_v49 = vld [vmem:[%s1580_s5] sm:$0xf] (!%p296_p3) }
   0x8   : > { %1224 = vmatprep.subr.bf16.mxu1 (!%p296_p3), %v1362_v0  ;;  %1226 = vmatprep.mubr.msk.bf16.mxu1 (!%p296_p3), %vm1363_vm0, %v1362_v0  ;;  %v625_v46 = vsel (!%p296_p3), %vm454_vm2, %v620_v45, 0  ;;  %v671_v52 = vsel (!%p296_p3), %vm454_vm2, %v499_v49, 0  ;;  %vm1041_vm3 = vcmask (!%p296_p3), 261120  }
   0xe   : > { %s1588_s24 = smov (!%p349_p4, %s1352_s24), 1 }
   0xf   : > { %s1434_s28 = sshll.u32 %s1588_s24, 2  ;;  %s366_s14 = scalar_lea.vmem %s1578_s3, %s1588_s24 }
  0x10   : > { %s359_s8 = scalar_lea.vmem %s1576_s1, %s1434_s28  ;;  %s355_s11 = scalar_lea.vmem %s1575_s0, %s1434_s28  ;;  %v1453_v4 = vld [vmem:[%s366_s14] ss:$0 sm:$0xff] }
  0x11   : > { %v383_v1 = vld [vmem:[%s359_s8] sm:$0xf]  ;;  %s363_s18 = scalar_lea.vmem %s1577_s2, %s1434_s28  ;;  %s1366_s28 = smov 104  }
  0x12   : > { %v397_v2 = vsel %vm392_vm1, %v383_v1, 0  ;;  %v382_v3 = vld [vmem:[%s355_s11] sm:$0xf]  ;;  %v1457_v11 = vcombine.low %v383_v1, %v383_v1  ;;  %s1173_s10 = sshll.u32 %s1588_s24, 3 }
  0x13   : > { %1219 = vmatpush3.bf16.xpose.msra.mxu0 %v397_v2  ;;  %v1461_v12 = vcombine.low %v382_v3, %v382_v3  ;;  %v384_v18 = vld [vmem:[%s363_s18] sm:$0xf]  ;;  %s373_s13 = scalar_lea.vmem %s1579_s4, %s1173_s10  ;;  %s380_s18 = scalar_lea.vmem %s1582_s7, %s1173_s10 }
  0x14   : > { %1236 = vmatprep.subr.bf16.mxu0 %v1362_v0  ;;  %508 = vrot.lane.b32.xlu1 %v1457_v11, %s1364_s15  ;;  %v456_v19 = vsel %vm454_vm2, %v384_v18, 0  ;;  %v1482_v37 = vcombine.low %v384_v18, %v384_v18 }
  0x15   : > { %1225 = vmatpush3.bf16.msra.mxu1 %v456_v19 }
  0x16   : > { %1230 = vmatprep.subr.bf16.mxu1 %v1362_v0 }
  0x18   : > { %503 = vrot.lane.b32.xlu1 %v1461_v12, %s1364_s15 }
  0x1a   : > { %1221 = vmatmul.mubr.msk.bf16.vlgmr.msra.gmra.mrb[0].mxu0 %vm392_vm1, %v382_v3 }
  0x1b   : > { %1238 = vmatprep.mubr.msk.bf16.mxu0 %vm1363_vm0, %v1362_v0 }
  0x86   : > { %v509_v22 = vpop.permute.xlu1 %508 }
  0x87   : > { %v514_v24 = vsel %vm392_vm1, %v509_v22, 0 }
  0x8a   : > { %v504_v26 = vpop.permute.xlu1 %503 }
  0xed   : > { %v433_v5 = vpop.f32.mrb[0].mxu0 }
  0xee   : > { %v434_v6 = vadd.f32 %v1453_v4, %v433_v5  ;;  %v1222_v7 = vpop.f32.mrb[1].mxu0 }
  0xef   : > { %v436_v8 = vpop.f32.mrb[2].mxu0 }
  0xf0   : > { %v1223_v9 = vpop.f32.mrb[3].mxu0  ;;  %v439_v10 = vsel %vm392_vm1, %v434_v6, -inf }
  0xf1   : > { %440 = vmax.xlane.f32.xlu0 %v439_v10 }
 0x17e   : > { %v441_v13 = vpop.xlane.xlu0 %440 }
 0x17f   : > { %v442_v14 = vsub.f32 %v434_v6, %v441_v13 }
 0x181   : > { %v443_v15 = vmul.f32 1.442695, %v442_v14 }
 0x183   : > { %1322 = vpow2.f32 %v443_v15 }
 0x18d   : > { %v1323_v16 = vpop.eup %1322 }
 0x18e   : > { %v445_v17 = vsel %vm392_vm1, %v1323_v16, 0.0 }
 0x18f   : > { %446 = vadd.xlane.f32.xlu0 %v445_v17 }
 0x21c   : > { %v447_v20 = vpop.xlane.xlu0 %446 }
 0x21d   : > { %1324 = vrcp.f32 %v447_v20 }
 0x227   : > { %v1325_v21 = vpop.eup %1324 }
 0x228   : > { %v449_v23 = vmul.f32 %v1325_v21, %v1323_v16 }
 0x22a   : > { %v450_v25 = vpack.c.bf16 %v449_v23, %v449_v23 }
 0x22c   : > { %1227 = vmatmul.mubr.msk.bf16.vlgmr.msra.gmra.mrb[0].mxu1 %vm392_vm1, %v450_v25 }
 0x22d   : > { %1231 = vmatpush3.bf16.xpose.msra.mxu1 %v514_v24  ;;  %1232 = vmatprep.mubr.msk.bf16.mxu1 %vm1363_vm0, %v1362_v0 }
 0x22e   : > { %1242 = vmatprep.subr.bf16.mxu1 %v1362_v0 }
 0x234   : > { %1233 = vmatmul.mubr.msk.bf16.vlgmr.msra.gmra.mrb[4].mxu1 %vm392_vm1, %v504_v26 }
 0x235   : > { %1244 = vmatprep.mubr.msk.bf16.mxu1 %vm1363_vm0, %v1362_v0  ;;  %1243 = vmatpush3.bf16.msra.mxu1 %v625_v46 }
 0x236   : > { %1254 = vmatprep.subr.bf16.mxu1 %v1362_v0 }
 0x2ff   : > { %v492_v27 = vpop.f32.mrb[0].mxu1 }
 0x300   : > { %v1228_v28 = vpop.f32.mrb[1].mxu1  ;;  %v498_v53 = vpack.c.bf16 %v492_v27, %v492_v27 }
 0x301   : > { %v495_v29 = vpop.f32.mrb[2].mxu1 }
 0x302   : > { %v1229_v30 = vpop.f32.mrb[3].mxu1 }
 0x307   : > { %v550_v31 = vpop.f32.mrb[4].mxu1 }
 0x308   : > { %v551_v32 = vadd.f32 %v1453_v4, %v550_v31  ;;  %v1234_v33 = vpop.f32.mrb[5].mxu1 }
 0x309   : > { %v553_v34 = vpop.f32.mrb[6].mxu1 }
 0x30a   : > { %v1235_v35 = vpop.f32.mrb[7].mxu1  ;;  %v556_v36 = vsel %vm392_vm1, %v551_v32, -inf }
 0x30b   : > { %557 = vmax.xlane.f32.xlu0 %v556_v36 }
 0x321   : > { %571 = vrot.lane.b32.xlu0 %v1482_v37, %s1364_s15 }
 0x325   : > { %715 = vrot.lane.b32.xlu0 %v1457_v11, %s1365_s21 }
 0x329   : > { %713 = vrot.lane.b32.xlu0 %v1461_v12, %s1365_s21 }
 0x398   : > { %v558_v38 = vpop.xlane.xlu0 %557 }
 0x399   : > { %v559_v39 = vsub.f32 %v551_v32, %v558_v38 }
 0x39b   : > { %v560_v40 = vmul.f32 1.442695, %v559_v39 }
 0x39c   : > { %v572_v43 = vpop.permute.xlu0 %571 }
 0x39d   : > { %1326 = vpow2.f32 %v560_v40  ;;  %v577_v44 = vsel %vm454_vm2, %v572_v43, 0 }
 0x39e   : > { %1237 = vmatpush3.bf16.msra.mxu0 %v577_v44 }
 0x39f   : > { %1248 = vmatprep.subr.bf16.mxu0 %v1362_v0 }
 0x3a0   : > { %v716_v54 = vpop.permute.xlu0 %715 }
 0x3a1   : > { %v721_v57 = vsel %vm392_vm1, %v716_v54, 0 }
 0x3a4   : > { %v714_v62 = vpop.permute.xlu0 %713 }
 0x3a7   : > { %v1327_v41 = vpop.eup %1326 }
 0x3a8   : > { %v562_v42 = vsel %vm392_vm1, %v1327_v41, 0.0 }
 0x3a9   : > { %563 = vadd.xlane.f32.xlu1 %v562_v42 }
 0x3ba   : > { %775 = vrot.lane.b32.xlu1 %v1482_v37, %s1365_s21 }
 0x436   : > { %v564_v47 = vpop.xlane.xlu1 %563 }
 0x437   : > { %1328 = vrcp.f32 %v564_v47 }
 0x43a   : > { %v776_v17 = vpop.permute.xlu1 %775 }
 0x43b   : > { %v781_v18 = vsel %vm454_vm2, %v776_v17, 0 }
 0x441   : > { %v1329_v48 = vpop.eup %1328 }
 0x442   : > { %v566_v50 = vmul.f32 %v1329_v48, %v1327_v41  ;;  %v983_v48 = vld [vmem:[%s1580_s5 + $0xc] sm:$0xf] }
 0x443   : > { %v988_v49 = vsel %vm454_vm2, %v983_v48, 0 }
 0x444   : > { %v567_v51 = vpack.c.bf16 %v566_v50, %v566_v50 }
 0x446   : > { %1239 = vmatmul.mubr.msk.bf16.vlgmr.msra.gmra.mrb[4].mxu0 %vm392_vm1, %v567_v51 }
 0x447   : > { %1249 = vmatpush3.bf16.msra.mxu0 %v671_v52  ;;  %1250 = vmatprep.mubr.msk.bf16.mxu0 %vm1363_vm0, %v1362_v0 }
 0x448   : > { %1260 = vmatprep.subr.bf16.mxu0 %v1362_v0 }
 0x44e   : > { %1251 = vmatmul.mubr.msk.bf16.vlgmr.msra.gmra.mrb[8].mxu0 %vm392_vm1, %v498_v53 }
 0x44f   : > { %1262 = vmatprep.mubr.msk.bf16.mxu0 %vm1363_vm0, %v1362_v0  ;;  %1261 = vmatpush3.bf16.msra.mxu0 %v781_v18 }
 0x450   : > { %1272 = vmatprep.subr.bf16.mxu0 %v1362_v0 }
 0x519   : > { %v613_v55 = vpop.f32.mrb[4].mxu0 }
 0x51a   : > { %v619_v56 = vpack.c.bf16 %v613_v55, %v613_v55  ;;  %v1240_v58 = vpop.f32.mrb[5].mxu0 }
 0x51b   : > { %v616_v59 = vpop.f32.mrb[6].mxu0 }
 0x51c   : > { %v1241_v60 = vpop.f32.mrb[7].mxu0  ;;  %1245 = vmatmul.mubr.msk.bf16.vlgmr.msra.gmra.mrb[8].mxu1 %vm392_vm1, %v619_v56 }
 0x51d   : > { %1255 = vmatpush3.bf16.xpose.msra.mxu1 %v721_v57  ;;  %1256 = vmatprep.mubr.msk.bf16.mxu1 %vm1363_vm0, %v1362_v0 }
 0x51e   : > { %1266 = vmatprep.subr.bf16.mxu1 %v1362_v0 }
 0x521   : > { %v707_v61 = vpop.f32.mrb[8].mxu0 }
 0x522   : > { %v1252_v63 = vpop.f32.mrb[9].mxu0 }
 0x523   : > { %v710_v1 = vpop.f32.mrb[10].mxu0 }
 0x524   : > { %v1253_v2 = vpop.f32.mrb[11].mxu0  ;;  %1257 = vmatmul.mubr.msk.bf16.vlgmr.msra.gmra.mrb[12].mxu1 %vm392_vm1, %v714_v62  ;;  %v1031_v1 = vld [vmem:[%s373_s13] sm:$0xff] }
 0x525   : > { %1268 = vmatprep.mubr.msk.bf16.mxu1 %vm1363_vm0, %v1362_v0 }
 0x5ef   : > { %v661_v3 = vpop.f32.mrb[8].mxu1 }
 0x5f0   : > { %v1516_v5 = vadd.f32 %v707_v61, %v661_v3  ;;  %v1246_v6 = vpop.f32.mrb[9].mxu1 }
 0x5f1   : > { %v664_v7 = vpop.f32.mrb[10].mxu1 }
 0x5f2   : > { %v1247_v8 = vpop.f32.mrb[11].mxu1 }
 0x5f7   : > { %v757_v9 = vpop.f32.mrb[12].mxu1 }
 0x5f8   : > { %v758_v10 = vadd.f32 %v1453_v4, %v757_v9  ;;  %v1258_v13 = vpop.f32.mrb[13].mxu1 }
 0x5f9   : > { %v760_v14 = vpop.f32.mrb[14].mxu1 }
 0x5fa   : > { %v1259_v15 = vpop.f32.mrb[15].mxu1  ;;  %v763_v16 = vsel %vm392_vm1, %v758_v10, -inf }
 0x5fb   : > { %764 = vmax.xlane.f32.xlu0 %v763_v16 }
 0x688   : > { %v765_v19 = vpop.xlane.xlu0 %764 }
 0x689   : > { %v766_v20 = vsub.f32 %v758_v10, %v765_v19 }
 0x68b   : > { %v767_v21 = vmul.f32 1.442695, %v766_v20 }
 0x68d   : > { %1330 = vpow2.f32 %v767_v21 }
 0x697   : > { %v1331_v22 = vpop.eup %1330 }
 0x698   : > { %v769_v23 = vsel %vm392_vm1, %v1331_v22, 0.0 }
 0x699   : > { %770 = vadd.xlane.f32.xlu1 %v769_v23 }
 0x6aa   : > { %874 = vrot.lane.b32.xlu1 %v1457_v11, %s1366_s28 }
 0x6ae   : > { %872 = vrot.lane.b32.xlu1 %v1461_v12, %s1366_s28  ;;  %v824_v12 = vld [vmem:[%s1580_s5 + $0x8] sm:$0xf] }
 0x6af   : > { %v829_v30 = vsel %vm454_vm2, %v824_v12, 0 }
 0x6b0   : > { %1267 = vmatpush3.bf16.msra.mxu1 %v829_v30 }
 0x6b1   : > { %1278 = vmatprep.subr.bf16.mxu1 %v1362_v0 }
 0x726   : > { %v771_v24 = vpop.xlane.xlu1 %770 }
 0x727   : > { %1332 = vrcp.f32 %v771_v24 }
 0x72a   : > { %v875_v26 = vpop.permute.xlu1 %874 }
 0x72b   : > { %v880_v28 = vsel %vm392_vm1, %v875_v26, 0 }
 0x72e   : > { %v873_v11 = vpop.permute.xlu1 %872 }
 0x731   : > { %v1333_v25 = vpop.eup %1332 }
 0x732   : > { %v773_v27 = vmul.f32 %v1333_v25, %v1331_v22 }
 0x734   : > { %v774_v29 = vpack.c.bf16 %v773_v27, %v773_v27 }
 0x736   : > { %1263 = vmatmul.mubr.msk.bf16.vlgmr.msra.gmra.mrb[12].mxu0 %vm392_vm1, %v774_v29 }
 0x737   : > { %1273 = vmatpush3.bf16.xpose.msra.mxu0 %v880_v28  ;;  %1274 = vmatprep.mubr.msk.bf16.mxu0 %vm1363_vm0, %v1362_v0 }
 0x738   : > { %1284 = vmatprep.subr.bf16.mxu0 %v1362_v0 }
 0x73e   : > { %1275 = vmatmul.mubr.msk.bf16.vlgmr.msra.gmra.mrb[16].mxu0 %vm392_vm1, %v873_v11 }
 0x73f   : > { %1286 = vmatprep.mubr.msk.bf16.mxu0 %vm1363_vm0, %v1362_v0  ;;  %1285 = vmatpush3.bf16.msra.mxu0 %v988_v49 }
 0x809   : > { %v817_v31 = vpop.f32.mrb[12].mxu0 }
 0x80a   : > { %v823_v32 = vpack.c.bf16 %v817_v31, %v817_v31  ;;  %v1264_v33 = vpop.f32.mrb[13].mxu0 }
 0x80b   : > { %v820_v34 = vpop.f32.mrb[14].mxu0 }
 0x80c   : > { %v1265_v35 = vpop.f32.mrb[15].mxu0  ;;  %1269 = vmatmul.mubr.msk.bf16.vlgmr.msra.gmra.mrb[16].mxu1 %vm392_vm1, %v823_v32 }
 0x80d   : > { %1280 = vmatprep.mubr.msk.bf16.mxu1 %vm1363_vm0, %v1362_v0 }
 0x811   : > { %v916_v36 = vpop.f32.mrb[16].mxu0 }
 0x812   : > { %v917_v38 = vadd.f32 %v1453_v4, %v916_v36  ;;  %v1276_v39 = vpop.f32.mrb[17].mxu0 }
 0x813   : > { %v919_v40 = vpop.f32.mrb[18].mxu0 }
 0x814   : > { %v1277_v41 = vpop.f32.mrb[19].mxu0  ;;  %v922_v42 = vsel %vm392_vm1, %v917_v38, -inf }
 0x815   : > { %923 = vmax.xlane.f32.xlu0 %v922_v42 }
 0x82b   : > { %934 = vrot.lane.b32.xlu0 %v1482_v37, %s1366_s28 }
 0x8a2   : > { %v924_v43 = vpop.xlane.xlu0 %923 }
 0x8a3   : > { %v925_v44 = vsub.f32 %v917_v38, %v924_v43 }
 0x8a5   : > { %v926_v45 = vmul.f32 1.442695, %v925_v44 }
 0x8a6   : > { %v935_v0 = vpop.permute.xlu0 %934 }
 0x8a7   : > { %1334 = vpow2.f32 %v926_v45  ;;  %v940_v4 = vsel %vm454_vm2, %v935_v0, 0 }
 0x8a8   : > { %1279 = vmatpush3.bf16.msra.mxu1 %v940_v4 }
 0x8b1   : > { %v1335_v46 = vpop.eup %1334 }
 0x8b2   : > { %v928_v47 = vsel %vm392_vm1, %v1335_v46, 0.0 }
 0x8b3   : > { %929 = vadd.xlane.f32.xlu1 %v928_v47 }
 0x8df   : > { %v865_v37 = vpop.f32.mrb[16].mxu1 }
 0x8e0   : > { %v871_v50 = vadd.f32 %v865_v37, %v1516_v5  ;;  %v1270_v51 = vpop.f32.mrb[17].mxu1  ;;  %v1191_v5 = vld [vmem:[%s1581_s6] ss:$0 sm:$0xff] }
 0x8e1   : > { %v868_v52 = vpop.f32.mrb[18].mxu1 }
 0x8e2   : > { %v1271_v53 = vpop.f32.mrb[19].mxu1 }
 0x940   : > { %v930_v54 = vpop.xlane.xlu1 %929 }
 0x941   : > { %1336 = vrcp.f32 %v930_v54 }
 0x94b   : > { %v1337_v55 = vpop.eup %1336 }
 0x94c   : > { %v932_v56 = vmul.f32 %v1337_v55, %v1335_v46 }
 0x94e   : > { %v933_v57 = vpack.c.bf16 %v932_v56, %v932_v56 }
 0x950   : > { %1281 = vmatmul.mubr.msk.bf16.vlgmr.msra.gmra.mrb[20].mxu1 %vm392_vm1, %v933_v57 }
 0xa23   : > { %v976_v58 = vpop.f32.mrb[20].mxu1 }
 0xa24   : > { %v982_v59 = vpack.c.bf16 %v976_v58, %v976_v58  ;;  %v1282_v60 = vpop.f32.mrb[21].mxu1 }
 0xa25   : > { %v979_v61 = vpop.f32.mrb[22].mxu1 }
 0xa26   : > { %v1283_v62 = vpop.f32.mrb[23].mxu1  ;;  %1287 = vmatmul.mubr.msk.bf16.vlgmr.msra.gmra.mrb[20].mxu0 %vm392_vm1, %v982_v59 }
 0xaf9   : > { %v1024_v63 = vpop.f32.mrb[20].mxu0 }
 0xafa   : > { %v1030_v2 = vadd.f32 %v1024_v63, %v871_v50  ;;  %v1288_v3 = vpop.f32.mrb[21].mxu0 }
 0xafb   : > { %v1027_v6 = vpop.f32.mrb[22].mxu0 }
 0xafc   : > { %v1032_v7 = vadd.f32 %v1031_v1, %v1030_v2  ;;  %v1289_v8 = vpop.f32.mrb[23].mxu0 }
 0xafe   : > { %v1040_v9 = vadd.f32 %v1191_v5, %v1032_v7 }
 0xb00   : > { %1042 = vst.msk [vmem:[%s380_s18] sm:$0xff] %vm1041_vm3, %v1040_v9 }
 0xb01 PF: > { %s17_s26 = sadd.s32 1, %s1360_s26   ;;  %s1583_s24 = smov %s1356_s25 }
 0xb02   : > { %p14_p5 = scmp.ge.s32.totalorder %s17_s26, 4   ;;  %s1584_s25 = smov %s1586_s27 }
 0xb04   :  { %16 = sbr.rel (!%p14_p5) target bundleno = 2 (0x2), region = 90 }

// kernel: model_head_forward.15
= control target key start
LH: loop header
LB: loop body
LE: loop exit
PB: predicated region body
PF: predicated region fallthrough
CT: control target
= control target key end

     0   :  { %v264_v0 = vmov 0.0   ;;  %vm265_vm0 = vmmov 0   ;;  %vm53_vm1 = vcmask 261120   ;;  %vm172_vm2 = vcmask 1043456   ;;  %s342_s1 = inlined_call_operand.vmem [shape: bf16[32,16], index: 1, kind: input, shape index: {}]   ;;  %s343_s0 = inlined_call_operand.vmem [shape: f32[16,32], index: 0, kind: input, shape index: {}]   ;;  %s344_s3 = inlined_call_operand.vmem [shape: bf16[16,8], index: 3, kind: input, shape index: {}]   ;;  %s345_s2 = inlined_call_operand.vmem [shape: f32[1,16], index: 2, kind: input, shape index: {}]   ;;  %s346_s5 = inlined_call_operand.vmem [shape: bf16[8,128], index: 5, kind: input, shape index: {}]   ;;  %s347_s4 = inlined_call_operand.vmem [shape: f32[1,8], index: 4, kind: input, shape index: {}]   ;;  %s348_s6 = inlined_call_operand.vmem [shape: f32[1,128], index: 6, kind: input, shape index: {}]   ;;  %s349_s7 = inlined_call_operand.vmem [shape: f32[16,128], index: 7, kind: output, shape index: {}]  }
   0x1   :  { %239 = vmatprep.subr.bf16.mxu0 %v264_v0  ;;  %v261_v1 = vld [vmem:[%s342_s1] sm:$0xff]   ;;  %243 = vmatprep.mubr.msk.bf16.mxu0 %vm265_vm0, %v264_v0  ;;  %v262_v2 = vld [vmem:[%s342_s1 + $0x8] sm:$0xff]   ;;  %vm114_vm3 = vcmask 130048   ;;  %vm168_vm4 = vcmask 64512  }
   0x2   :  { %247 = vmatprep.subr.bf16.mxu1 %v264_v0  ;;  %249 = vmatprep.mubr.msk.bf16.mxu1 %vm265_vm0, %v264_v0  ;;  %v27_v3 = vld [vmem:[%s343_s0] sm:$0xff]  ;;  %v28_v4 = vld [vmem:[%s343_s0 + $0x8] sm:$0xff] }
   0x3   :  { %240 = vmatpush3.bf16.msra.mxu0 %v261_v1  ;;  %v29_v5 = vpack.c.bf16 %v28_v4, %v27_v3  ;;  %v263_v6 = vld [vmem:[%s344_s3] sm:$0xff]  }
   0x4   :  { %241 = vmatprep.subr.bf16.mxu0 %v264_v0  ;;  %248 = vmatpush3.bf16.msra.mxu1 %v263_v6  ;;  %v223_v7 = vld [vmem:[%s345_s2] ss:$0 sm:$0xff] }
   0x5   :  { %253 = vmatprep.subr.bf16.mxu1 %v264_v0  ;;  %v160_v11 = vld [vmem:[%s346_s5] sm:$0xf] }
   0x6   :  { %v174_v16 = vsel %vm172_vm2, %v160_v11, 0  ;;  %v227_v17 = vld [vmem:[%s347_s4] ss:$0 sm:$0xff] }
   0x7   :  { %242 = vmatpush3.bf16.msra.mxu0 %v262_v2  ;;  %v230_v25 = vld [vmem:[%s348_s6] ss:$0 sm:$0xff] }
   0xa   :  { %244 = vmatmul.mubr.msk.bf16.vlgmr.msra.gmra.mrb[0].mxu0 %vm53_vm1, %v29_v5 }
  0xdd   :  { %v91_v8 = vpop.f32.mrb[0].mxu0 }
  0xde   :  { %v245_v9 = vpop.f32.mrb[1].mxu0  ;;  %v92_v12 = vadd.f32 %v223_v7, %v91_v8 }
  0xdf   :  { %v94_v10 = vpop.f32.mrb[2].mxu0 }
  0xe0   :  { %v95_v13 = vadd.f32 %v223_v7, %v94_v10  ;;  %v246_v14 = vpop.f32.mrb[3].mxu0 }
  0xe2   :  { %v98_v15 = vpack.c.bf16 %v95_v13, %v92_v12 }
  0xe4   :  { %250 = vmatmul.mubr.msk.bf16.vlgmr.msra.gmra.mrb[0].mxu1 %vm114_vm3, %v98_v15 }
  0xe5   :  { %254 = vmatpush3.bf16.msra.mxu1 %v174_v16  ;;  %255 = vmatprep.mubr.msk.bf16.mxu1 %vm265_vm0, %v264_v0 }
 0x1b7   :  { %v152_v18 = vpop.f32.mrb[0].mxu1 }
 0x1b8   :  { %v251_v19 = vpop.f32.mrb[1].mxu1  ;;  %v153_v21 = vadd.f32 %v227_v17, %v152_v18 }
 0x1b9   :  { %v155_v20 = vpop.f32.mrb[2].mxu1 }
 0x1ba   :  { %v156_v22 = vadd.f32 %v227_v17, %v155_v20  ;;  %v252_v23 = vpop.f32.mrb[3].mxu1 }
 0x1bc   :  { %v159_v24 = vpack.c.bf16 %v156_v22, %v153_v21 }
 0x1be   :  { %256 = vmatmul.mubr.msk.bf16.vlgmr.msra.gmra.mrb[4].mxu1 %vm168_vm4, %v159_v24 }
 0x291   :  { %v210_v26 = vpop.f32.mrb[4].mxu1 }
 0x292   :  { %v211_v27 = vadd.f32 %v230_v25, %v210_v26  ;;  %v257_v28 = vpop.f32.mrb[5].mxu1 }
 0x293   :  { %v213_v29 = vpop.f32.mrb[6].mxu1 }
 0x294   :  { %217 = vst [vmem:[%s349_s7] sm:$0xff] %v211_v27  ;;  %v214_v30 = vadd.f32 %v230_v25, %v213_v29  ;;  %v258_v31 = vpop.f32.mrb[7].mxu1 }
 0x296   :  { %218 = vst [vmem:[%s349_s7 + $0x8] sm:$0xff] %v214_v30 }

</bundles_post_ra>
